<compile_context>
chip_gen: v7x
topology: tpu7x:2x2x1
jax: 0.10.0
libtpu: 0.0.40
codegen_flags: <defaults>
</compile_context>

<pallas_src>
import jax
import jax.numpy as jnp
from jax.experimental import pallas as pl
from jax.experimental.pallas import tpu as pltpu


def _round_up(a, b):
    return (a + b - 1) // b * b


def gearnet_kernel(dist_ref, row_ref, xcol_ref, w1a_ref, we_w1b_ref,
                   h_bias_ref, w2_ref, b2_ref, out_ref, iota_ref):
    i_e = pl.program_id(1)
    mxu_dtype = w2_ref.dtype          # bf16 or f32 operands, f32 accumulation

    @pl.when(i_e == 0)
    def _():
        # P3 accumulator init + hoist of the loop-invariant node-id iota.
        out_ref[...] = jnp.zeros_like(out_ref)
        iota_ref[...] = jax.lax.broadcasted_iota(jnp.int32, iota_ref.shape, 0)

    # Folded edge MLP:  h = x[col] @ w1a + dist * (we@w1b) + (be@w1b + b1)
    h = jnp.dot(xcol_ref[...], w1a_ref[...],
                preferred_element_type=jnp.float32)                     # [TE, D]
    h = h + dist_ref[...] * we_w1b_ref[...] + h_bias_ref[...]
    h = jnp.maximum(h, 0.0)                                             # ReLU

    msg = jnp.dot(h.astype(mxu_dtype), w2_ref[...],
                  preferred_element_type=jnp.float32) + b2_ref[...]     # [TE, D]

    # Scatter-add into this core's node rows via a one-hot MXU matmul.
    # Padded edges carry the sentinel row == N_pad -> match nothing.
    scatter_oh = (iota_ref[...] == row_ref[...]).astype(mxu_dtype)      # [N_pad, TE]
    out_ref[...] += jnp.dot(scatter_oh, msg.astype(mxu_dtype),
                            preferred_element_type=jnp.float32)


def gearnet_layer(x, coord, edge_index, params, *, edge_tile=512, n_cores=1,
                  mxu_dtype=jnp.float32):
    """x: [N, D], coord: [N, 3], edge_index: [2, E].

    params = (we [1,D], be [D], w1t [2D,D], b1 [D], w2t [D,D], b2 [D]) with all
    Linear weights pre-transposed to [in_features, out_features].
    n_cores shards the EDGE axis across TensorCores (use >1 only on megacore);
    mxu_dtype=jnp.bfloat16 casts MXU operands (recommended on v6e/v7x).
    """
    we, be, w1t, b1, w2t, b2 = params
    row = edge_index[0].astype(jnp.int32)
    col = edge_index[1].astype(jnp.int32)
    N, D = x.shape
    E = row.shape[0]
    f32 = jnp.float32

    D_pad = _round_up(D, 128)                   # lane-dense features
    N_pad = _round_up(N, 8)
    TE = edge_tile                              # multiple of 256 (MXU friendly)
    E_pad = _round_up(max(E, 1), TE * n_cores)
    tiles_per_core = E_pad // (TE * n_cores)

    x32 = x.astype(f32)

    # ---- wrapper glue: distance, real row gather, exact weight folds, padding ----
    dx = coord[row].astype(f32) - coord[col].astype(f32)                  # [E, 3]
    dist = jnp.sqrt(jnp.sum(dx * dx, axis=-1, keepdims=True))             # [E, 1]
    xcol = x32[col]                                                       # [E, D]

    w1a = w1t[:D, :].astype(f32)                # acts on x[col] half of concat
    w1b = w1t[D:, :].astype(f32)                # acts on edge_attr half of concat
    we_w1b = (we.astype(f32) @ w1b).reshape(1, D)                         # [1, D]
    h_bias = (be.astype(f32) @ w1b + b1.astype(f32)).reshape(1, D)        # [1, D]

    def pad2(a, r, c):
        return jnp.pad(a, ((0, r - a.shape[0]), (0, c - a.shape[1])))

    xcol_p   = pad2(xcol, E_pad, D_pad).astype(mxu_dtype)
    w1a_p    = pad2(w1a, D_pad, D_pad).astype(mxu_dtype)
    w2_p     = pad2(w2t.astype(f32), D_pad, D_pad).astype(mxu_dtype)
    we_w1b_p = pad2(we_w1b, 1, D_pad)
    h_bias_p = pad2(h_bias, 1, D_pad)
    b2_p     = pad2(b2.astype(f32).reshape(1, D), 1, D_pad)
    dist_p   = jnp.pad(dist, ((0, E_pad - E), (0, 0)))
    # padded edges scatter to a sentinel row >= N_pad -> never match any node
    row_p    = jnp.pad(row, (0, E_pad - E), constant_values=N_pad).reshape(1, E_pad)

    grid = (n_cores, tiles_per_core)

    def edge_blk(c, e):
        return (c * tiles_per_core + e, 0)

    def full_spec(shape):
        return pl.BlockSpec(shape, lambda c, e: (0, 0))

    in_specs = [
        pl.BlockSpec((TE, 1), edge_blk),                                  # dist
        pl.BlockSpec((1, TE), lambda c, e: (0, c * tiles_per_core + e)),  # row
        pl.BlockSpec((TE, D_pad), edge_blk),                              # x[col]
        full_spec((D_pad, D_pad)),                                        # w1a
        full_spec((1, D_pad)),                                            # we @ w1b
        full_spec((1, D_pad)),                                            # be @ w1b + b1
        full_spec((D_pad, D_pad)),                                        # w2
        full_spec((1, D_pad)),                                            # b2
    ]
    out_specs = pl.BlockSpec((None, N_pad, D_pad), lambda c, e: (c, 0, 0))

    it = jnp.dtype(mxu_dtype).itemsize

    # advisory cost estimate
    flops = 4 * E_pad * D_pad * D_pad + 2 * E_pad * N_pad * D_pad
    bytes_accessed = (E_pad * D_pad * it + 8 * E_pad
                      + 2 * D_pad * D_pad * it + 3 * D_pad * 4
                      + n_cores * N_pad * D_pad * 4)

    # VMEM budget: resident weights + double-buffered edge tiles + output block
    # + iota scratch + in-kernel temporaries (one-hot, bool compare, h, msg, casts).
    vmem_est = (2 * D_pad * D_pad * it                    # w1a + w2 resident
                + 2 * 3 * D_pad * 4                       # small bias vectors
                + 2 * (TE * D_pad * it + 2 * TE * 4)      # edge tiles (2 buffers)
                + 2 * N_pad * D_pad * 4                   # output block
                + N_pad * TE * 4                          # iota scratch
                + N_pad * TE * (it + 1)                   # scatter one-hot + compare
                + TE * D_pad * (8 + 2 * it))              # h, msg (+ bf16 casts)
    try:
        vmem_cap = int(pltpu.get_tpu_info().vmem_capacity_bytes)
    except Exception:
        vmem_cap = 64 * 1024 * 1024                       # conservative (v7x)
    vmem_limit = int(max(16 * 1024 * 1024,
                         min(int(0.75 * vmem_cap), 2 * vmem_est)))

    out_p = pl.pallas_call(
        gearnet_kernel,
        out_shape=jax.ShapeDtypeStruct((n_cores, N_pad, D_pad), f32),
        grid_spec=pltpu.PrefetchScalarGridSpec(
            num_scalar_prefetch=0,
            grid=grid,
            in_specs=in_specs,
            out_specs=out_specs,
            scratch_shapes=[pltpu.VMEM((N_pad, TE), jnp.int32)]),
        compiler_params=pltpu.CompilerParams(
            dimension_semantics=("parallel", "arbitrary"),
            vmem_limit_bytes=vmem_limit),
        cost_estimate=pl.CostEstimate(flops=flops, transcendentals=0,
                                      bytes_accessed=bytes_accessed),
    )(dist_p, row_p, xcol_p, w1a_p, we_w1b_p, h_bias_p, w2_p, b2_p)

    # Cross-core partial-aggregate sum + residual add (cheap XLA epilogue).
    agg = jnp.sum(out_p, axis=0)[:N, :D]
    return (x32 + agg).astype(x.dtype)


def reference(x, coord, row, col, params):
    """Pure-JAX reference matching the PyTorch forward."""
    we, be, w1t, b1, w2t, b2 = params
    dx = coord[row] - coord[col]
    dist = jnp.sqrt(jnp.sum(dx * dx, axis=-1, keepdims=True))
    edge_attr = dist @ we + be
    edge_msg = jnp.concatenate([x[col], edge_attr], axis=-1)
    h = jnp.maximum(edge_msg @ w1t + b1, 0.0)
    msg = h @ w2t + b2
    agg = jnp.zeros_like(x).at[row].add(msg)
    return x + agg


def _make_case(key, N, D, E):
    ks = jax.random.split(key, 10)
    x = jax.random.normal(ks[0], (N, D), jnp.float32)
    coord = jax.random.normal(ks[1], (N, 3), jnp.float32)
    row = jax.random.randint(ks[2], (E,), 0, N, dtype=jnp.int32)
    col = jax.random.randint(ks[3], (E,), 0, N, dtype=jnp.int32)
    edge_index = jnp.stack([row, col], axis=0)
    we = jax.random.normal(ks[4], (1, D), jnp.float32) * 0.5
    be = jax.random.normal(ks[5], (D,), jnp.float32) * 0.1
    w1t = jax.random.normal(ks[6], (2 * D, D), jnp.float32) * (1.0 / jnp.sqrt(2.0 * D))
    b1 = jax.random.normal(ks[7], (D,), jnp.float32) * 0.1
    w2t = jax.random.normal(ks[8], (D, D), jnp.float32) * (1.0 / jnp.sqrt(1.0 * D))
    b2 = jax.random.normal(ks[9], (D,), jnp.float32) * 0.1
    params = (we, be, w1t, b1, w2t, b2)
    return x, coord, row, col, edge_index, params


if __name__ == "__main__":
    key = jax.random.PRNGKey(0)
    k1, k2 = jax.random.split(key)

    # Case 1: tiny shapes (single edge tile, single core), f32 MXU path.
    x, coord, row, col, edge_index, params = _make_case(k1, N=8, D=32, E=16)
    out = gearnet_layer(x, coord, edge_index, params, n_cores=1,
                        mxu_dtype=jnp.float32)
    out = jax.block_until_ready(out)
    ref = reference(x, coord, row, col, params)
    assert out.shape == x.shape, out.shape
    err1 = float(jnp.max(jnp.abs(out - ref)))
    assert jnp.allclose(out, ref, atol=1e-3, rtol=1e-3), err1

    # Case 2: padded D, edges sharded over 2 "core" tiles (correct even on a
    # single-TensorCore chip — the parallel axis just serializes).
    x, coord, row, col, edge_index, params = _make_case(k2, N=48, D=160, E=600)
    ref = reference(x, coord, row, col, params)

    out32 = gearnet_layer(x, coord, edge_index, params, n_cores=2,
                          mxu_dtype=jnp.float32)
    out32 = jax.block_until_ready(out32)
    err2 = float(jnp.max(jnp.abs(out32 - ref)))
    assert jnp.allclose(out32, ref, atol=2e-3, rtol=2e-3), err2

    # Same case with bf16 MXU operands (v6e/v7x fast path), bf16-level tolerance.
    outbf = gearnet_layer(x, coord, edge_index, params, n_cores=2,
                          mxu_dtype=jnp.bfloat16)
    outbf = jax.block_until_ready(outbf)
    rel = float(jnp.linalg.norm(outbf - ref) / jnp.linalg.norm(ref))
    assert rel < 3e-2, rel

    print("KERNEL_OK")
</pallas_src>

<mosaic_0001>
module attributes {stable_mosaic.version = 11 : i64} {
  func.func @gearnet_kernel(%arg0: i32, %arg1: i32, %arg2: memref<512x1xf32, #tpu.memory_space<vmem>>, %arg3: memref<1x512xi32, #tpu.memory_space<vmem>>, %arg4: memref<512x128xf32, #tpu.memory_space<vmem>>, %arg5: memref<128x128xf32, #tpu.memory_space<vmem>>, %arg6: memref<1x128xf32, #tpu.memory_space<vmem>>, %arg7: memref<1x128xf32, #tpu.memory_space<vmem>>, %arg8: memref<128x128xf32, #tpu.memory_space<vmem>>, %arg9: memref<1x128xf32, #tpu.memory_space<vmem>>, %arg10: memref<1x8x128xf32, #tpu.memory_space<vmem>>, %arg11: memref<8x512xi32, #tpu.memory_space<vmem>>) attributes {dimension_semantics = [#tpu.dimension_semantics<parallel>, #tpu.dimension_semantics<arbitrary>], iteration_bounds = array<i64: 1, 1>, scalar_prefetch = 0 : i64, scratch_operands = 1 : i64, tpu.core_type = #tpu.core_type<tc>, window_params = [{transform_indices = @transform_0, window_bounds = array<i64: 512, 1>}, {transform_indices = @transform_1, window_bounds = array<i64: 1, 512>}, {transform_indices = @transform_2, window_bounds = array<i64: 512, 128>}, {pipeline_mode = #tpu.pipeline_mode<synchronous>, transform_indices = @transform_3, window_bounds = array<i64: 128, 128>}, {pipeline_mode = #tpu.pipeline_mode<synchronous>, transform_indices = @transform_4, window_bounds = array<i64: 1, 128>}, {pipeline_mode = #tpu.pipeline_mode<synchronous>, transform_indices = @transform_5, window_bounds = array<i64: 1, 128>}, {pipeline_mode = #tpu.pipeline_mode<synchronous>, transform_indices = @transform_6, window_bounds = array<i64: 128, 128>}, {pipeline_mode = #tpu.pipeline_mode<synchronous>, transform_indices = @transform_7, window_bounds = array<i64: 1, 128>}, {transform_indices = @transform_8, window_bounds = array<i64: 1, 8, 128>}]} {
    %c0_i32 = arith.constant 0 : i32
    %0 = arith.cmpi eq, %arg1, %c0_i32 : i32
    %1 = arith.extui %0 : i1 to i32
    %c0_i32_0 = arith.constant 0 : i32
    %2 = arith.cmpi ne, %1, %c0_i32_0 : i32
    scf.if %2 {
      %cst_27 = arith.constant 0.000000e+00 : f32
      %35 = vector.broadcast %cst_27 : f32 to vector<8x128xf32>
      %c0_28 = arith.constant 0 : index
      %c0_29 = arith.constant 0 : index
      %c0_30 = arith.constant 0 : index
      %36 = vector.load %arg10[%c0_28, %c0_29, %c0_30] : memref<1x8x128xf32, #tpu.memory_space<vmem>>, vector<1x8x128xf32>
      %37 = vector.shape_cast %36 : vector<1x8x128xf32> to vector<8x128xf32>
      %38 = vector.shape_cast %35 : vector<8x128xf32> to vector<1x8x128xf32>
      tpu.vector_store %arg10[%c0_28, %c0_29, %c0_30], %38 {strides = array<i32>} : memref<1x8x128xf32, #tpu.memory_space<vmem>>, vector<1x8x128xf32>,
      %39 = tpu.iota {dimensions = array<i32: 0>} : vector<8x512xi32>
      %c0_31 = arith.constant 0 : index
      %c0_32 = arith.constant 0 : index
      %40 = vector.load %arg11[%c0_31, %c0_32] : memref<8x512xi32, #tpu.memory_space<vmem>>, vector<8x512xi32>
      tpu.vector_store %arg11[%c0_31, %c0_32], %39 {strides = array<i32>} : memref<8x512xi32, #tpu.memory_space<vmem>>, vector<8x512xi32>,
    } else {
    }
    %c0 = arith.constant 0 : index
    %c0_1 = arith.constant 0 : index
    %3 = vector.load %arg4[%c0, %c0_1] : memref<512x128xf32, #tpu.memory_space<vmem>>, vector<512x128xf32>
    %c0_2 = arith.constant 0 : index
    %c0_3 = arith.constant 0 : index
    %4 = vector.load %arg5[%c0_2, %c0_3] : memref<128x128xf32, #tpu.memory_space<vmem>>, vector<128x128xf32>
    %cst = arith.constant dense<0.000000e+00> : vector<512x128xf32>
    %5 = tpu.matmul %3, %4, %cst {dimension_numbers = #tpu.dot_dimension_numbers<[1], [0], [0], [1], [0, 0, 1, 1], [], []>} : vector<512x128xf32>, vector<128x128xf32>, vector<512x128xf32> -> vector<512x128xf32>
    %c0_4 = arith.constant 0 : index
    %c0_5 = arith.constant 0 : index
    %6 = vector.load %arg2[%c0_4, %c0_5] : memref<512x1xf32, #tpu.memory_space<vmem>>, vector<512x1xf32>
    %c0_6 = arith.constant 0 : index
    %c0_7 = arith.constant 0 : index
    %7 = vector.load %arg6[%c0_6, %c0_7] : memref<1x128xf32, #tpu.memory_space<vmem>>, vector<1x128xf32>
    %8 = vector.broadcast %6 : vector<512x1xf32> to vector<512x128xf32>
    %9 = vector.broadcast %7 : vector<1x128xf32> to vector<512x128xf32>
    %10 = arith.mulf %8, %9 : vector<512x128xf32>
    %11 = arith.addf %5, %10 : vector<512x128xf32>
    %c0_8 = arith.constant 0 : index
    %c0_9 = arith.constant 0 : index
    %12 = vector.load %arg7[%c0_8, %c0_9] : memref<1x128xf32, #tpu.memory_space<vmem>>, vector<1x128xf32>
    %13 = vector.broadcast %12 : vector<1x128xf32> to vector<512x128xf32>
    %14 = arith.addf %11, %13 : vector<512x128xf32>
    %cst_10 = arith.constant 0.000000e+00 : f32
    %15 = vector.broadcast %cst_10 : f32 to vector<512x128xf32>
    %16 = arith.maximumf %14, %15 : vector<512x128xf32>
    %c0_11 = arith.constant 0 : index
    %c0_12 = arith.constant 0 : index
    %17 = vector.load %arg8[%c0_11, %c0_12] : memref<128x128xf32, #tpu.memory_space<vmem>>, vector<128x128xf32>
    %cst_13 = arith.constant dense<0.000000e+00> : vector<512x128xf32>
    %18 = tpu.matmul %16, %17, %cst_13 {dimension_numbers = #tpu.dot_dimension_numbers<[1], [0], [0], [1], [0, 0, 1, 1], [], []>} : vector<512x128xf32>, vector<128x128xf32>, vector<512x128xf32> -> vector<512x128xf32>
    %c0_14 = arith.constant 0 : index
    %c0_15 = arith.constant 0 : index
    %19 = vector.load %arg9[%c0_14, %c0_15] : memref<1x128xf32, #tpu.memory_space<vmem>>, vector<1x128xf32>
    %20 = vector.broadcast %19 : vector<1x128xf32> to vector<512x128xf32>
    %21 = arith.addf %18, %20 : vector<512x128xf32>
    %c0_16 = arith.constant 0 : index
    %c0_17 = arith.constant 0 : index
    %22 = vector.load %arg11[%c0_16, %c0_17] : memref<8x512xi32, #tpu.memory_space<vmem>>, vector<8x512xi32>
    %c0_18 = arith.constant 0 : index
    %c0_19 = arith.constant 0 : index
    %23 = vector.load %arg3[%c0_18, %c0_19] : memref<1x512xi32, #tpu.memory_space<vmem>>, vector<1x512xi32>
    %24 = vector.broadcast %23 : vector<1x512xi32> to vector<8x512xi32>
    %25 = arith.cmpi eq, %22, %24 : vector<8x512xi32>
    %26 = arith.extui %25 : vector<8x512xi1> to vector<8x512xi32>
    %27 = arith.sitofp %26 : vector<8x512xi32> to vector<8x512xf32>
    %c0_20 = arith.constant 0 : index
    %c0_21 = arith.constant 0 : index
    %c0_22 = arith.constant 0 : index
    %28 = vector.load %arg10[%c0_20, %c0_21, %c0_22] : memref<1x8x128xf32, #tpu.memory_space<vmem>>, vector<1x8x128xf32>
    %29 = vector.shape_cast %28 : vector<1x8x128xf32> to vector<8x128xf32>
    %cst_23 = arith.constant dense<0.000000e+00> : vector<8x128xf32>
    %30 = tpu.matmul %27, %21, %cst_23 {dimension_numbers = #tpu.dot_dimension_numbers<[1], [0], [0], [1], [0, 0, 1, 1], [], []>} : vector<8x512xf32>, vector<512x128xf32>, vector<8x128xf32> -> vector<8x128xf32>
    %31 = arith.addf %29, %30 : vector<8x128xf32>
    %c0_24 = arith.constant 0 : index
    %c0_25 = arith.constant 0 : index
    %c0_26 = arith.constant 0 : index
    %32 = vector.load %arg10[%c0_24, %c0_25, %c0_26] : memref<1x8x128xf32, #tpu.memory_space<vmem>>, vector<1x8x128xf32>
    %33 = vector.shape_cast %32 : vector<1x8x128xf32> to vector<8x128xf32>
    %34 = vector.shape_cast %31 : vector<8x128xf32> to vector<1x8x128xf32>
    tpu.vector_store %arg10[%c0_24, %c0_25, %c0_26], %34 {strides = array<i32>} : memref<1x8x128xf32, #tpu.memory_space<vmem>>, vector<1x8x128xf32>,
    return
  }
  func.func @transform_0(%arg0: i32, %arg1: i32) -> (i32, i32) {
    %c1_i32 = arith.constant 1 : i32
    %0 = arith.muli %arg0, %c1_i32 : i32
    %1 = arith.addi %0, %arg1 : i32
    %c0_i32 = arith.constant 0 : i32
    %c0_i32_0 = arith.constant 0 : i32
    return %1, %c0_i32 : i32, i32
  }
  func.func @transform_1(%arg0: i32, %arg1: i32) -> (i32, i32) {
    %c1_i32 = arith.constant 1 : i32
    %0 = arith.muli %arg0, %c1_i32 : i32
    %1 = arith.addi %0, %arg1 : i32
    %c0_i32 = arith.constant 0 : i32
    %c0_i32_0 = arith.constant 0 : i32
    return %c0_i32, %1 : i32, i32
  }
  func.func @transform_2(%arg0: i32, %arg1: i32) -> (i32, i32) {
    %c1_i32 = arith.constant 1 : i32
    %0 = arith.muli %arg0, %c1_i32 : i32
    %1 = arith.addi %0, %arg1 : i32
    %c0_i32 = arith.constant 0 : i32
    %c0_i32_0 = arith.constant 0 : i32
    return %1, %c0_i32 : i32, i32
  }
  func.func @transform_3(%arg0: i32, %arg1: i32) -> (i32, i32) {
    %c0_i32 = arith.constant 0 : i32
    %c0_i32_0 = arith.constant 0 : i32
    %c0_i32_1 = arith.constant 0 : i32
    return %c0_i32, %c0_i32_0 : i32, i32
  }
  func.func @transform_4(%arg0: i32, %arg1: i32) -> (i32, i32) {
    %c0_i32 = arith.constant 0 : i32
    %c0_i32_0 = arith.constant 0 : i32
    %c0_i32_1 = arith.constant 0 : i32
    return %c0_i32, %c0_i32_0 : i32, i32
  }
  func.func @transform_5(%arg0: i32, %arg1: i32) -> (i32, i32) {
    %c0_i32 = arith.constant 0 : i32
    %c0_i32_0 = arith.constant 0 : i32
    %c0_i32_1 = arith.constant 0 : i32
    return %c0_i32, %c0_i32_0 : i32, i32
  }
  func.func @transform_6(%arg0: i32, %arg1: i32) -> (i32, i32) {
    %c0_i32 = arith.constant 0 : i32
    %c0_i32_0 = arith.constant 0 : i32
    %c0_i32_1 = arith.constant 0 : i32
    return %c0_i32, %c0_i32_0 : i32, i32
  }
  func.func @transform_7(%arg0: i32, %arg1: i32) -> (i32, i32) {
    %c0_i32 = arith.constant 0 : i32
    %c0_i32_0 = arith.constant 0 : i32
    %c0_i32_1 = arith.constant 0 : i32
    return %c0_i32, %c0_i32_0 : i32, i32
  }
  func.func @transform_8(%arg0: i32, %arg1: i32) -> (i32, i32, i32) {
    %c0_i32 = arith.constant 0 : i32
    %c0_i32_0 = arith.constant 0 : i32
    %c0_i32_1 = arith.constant 0 : i32
    return %arg0, %c0_i32, %c0_i32_0 : i32, i32, i32
  }
}

</mosaic_0001>

<bundles_post_ra>
// kernel: tpu_custom_call.1
= control target key start
LH: loop header
LB: loop body
LE: loop exit
PB: predicated region body
PF: predicated region fallthrough
CT: control target
= control target key end

     0   :  { %13 = vsyncpa [#allocation4], 0  ;;  %s3337_s0 = inlined_call_operand.vmem [shape: f32[512,1], index: 0, kind: input, shape index: {}]   ;;  %s3338_s1 = inlined_call_operand.vmem [shape: s32[1,512], index: 1, kind: input, shape index: {}]   ;;  %s3339_s2 = inlined_call_operand.vmem [shape: f32[512,128], index: 2, kind: input, shape index: {}]   ;;  %s3340_s3 = inlined_call_operand.hbm [shape: f32[128,128], index: 3, kind: input, shape index: {}]   ;;  %s3341_s4 = inlined_call_operand.vmem [shape: f32[1,128], index: 4, kind: input, shape index: {}]   ;;  %s3342_s5 = inlined_call_operand.vmem [shape: f32[1,128], index: 5, kind: input, shape index: {}]   ;;  %s3343_s6 = inlined_call_operand.hbm [shape: f32[128,128], index: 6, kind: input, shape index: {}]   ;;  %s3344_s7 = inlined_call_operand.vmem [shape: f32[1,128], index: 7, kind: input, shape index: {}]   ;;  %s3345_s8 = inlined_call_operand.hbm [shape: f32[1,8,128], index: 8, kind: output, shape index: {}]  }
   0x1   :  { %14 = vsyncpa [#allocation7], 0 }
   0x2   :  { %15 = vsyncpa [#allocation5], 0  ;;  %s2509_s27 = smov [#allocation3]   ;;  %s2437_s9 = scalar_lea.hbm %s3340_s3, 2048 }
   0x3   :  { %s50_s28 = sshll.u32 %s2509_s27, 4  ;;  %p2438_p0 = scmp.ne.s32.totalorder %s3340_s3, %s2437_s9  ;;  %s51_s28 = int_to_ptr.vmem [resolvable:$true] %s50_s28 }
   0x4   :  { %p2441_p1 = scmp.lt.u32.totalorder %s2437_s9, %s3340_s3 }
   0x6   :  { %p2443_p2 = pnand %p2441_p1, %p2438_p0 }
   0x8   :  { %2446 = shalt.err (!%p2443_p2)
}
   0x9   :  { %s2447_s14 = scalar_lea.vmem %s51_s28, 2048  ;;  %p2452_p4 = scmp.lt.s32.totalorder %s51_s28, %s51_s28 }
   0xa   :  { %p2448_p3 = scmp.ne.s32.totalorder %s51_s28, %s2447_s14  ;;  %p2453_p5 = scmp.lt.s32.totalorder %s2447_s14, %s2447_s14 }
   0xc   :  { %p2454_p6 = por %p2453_p5, %p2452_p4 }
   0xe   :  { %p2455_p7 = pnand %p2454_p6, %p2448_p3 }
  0x10   :  { %2458 = shalt.err (!%p2455_p7)
}
  0x11   :  { %s2510_s15 = smov 128   ;;  %s2511_s16 = smov 8  }
  0x12   :  { %56 = dma.hbm_to_vmem [thread:$0]  %s3340_s3, 2048, %s51_s28, [#allocation4], %s2510_s15, %s2510_s15, %s2511_s16  }
  0x13   :  { %s2512_s19 = smov [#allocation6]   ;;  %s2459_s23 = scalar_lea.hbm %s3343_s6, 2048 }
  0x14   :  { %s66_s20 = sshll.u32 %s2512_s19, 4  ;;  %p2460_p8 = scmp.ne.s32.totalorder %s3343_s6, %s2459_s23  ;;  %s67_s20 = int_to_ptr.vmem [resolvable:$true] %s66_s20 }
  0x15   :  { %p2463_p9 = scmp.lt.u32.totalorder %s2459_s23, %s3343_s6 }
  0x17   :  { %p2465_p10 = pnand %p2463_p9, %p2460_p8 }
  0x19   :  { %2468 = shalt.err (!%p2465_p10)
}
  0x1a   :  { %s2469_s29 = scalar_lea.vmem %s67_s20, 2048  ;;  %p2474_p12 = scmp.lt.s32.totalorder %s67_s20, %s67_s20 }
  0x1b   :  { %p2470_p11 = scmp.ne.s32.totalorder %s67_s20, %s2469_s29  ;;  %p2475_p13 = scmp.lt.s32.totalorder %s2469_s29, %s2469_s29 }
  0x1d   :  { %p2476_p0 = por %p2475_p13, %p2474_p12 }
  0x1f   :  { %p2477_p1 = pnand %p2476_p0, %p2470_p11 }
  0x21   :  { %2480 = shalt.err (!%p2477_p1)
}
  0x22   :  { %72 = dma.hbm_to_vmem [thread:$0]  %s3343_s6, 2048, %s67_s20, [#allocation7], %s2510_s15, %s2510_s15, %s2511_s16  }
  0x23   :  { %2503 = dma.done.wait [#allocation4], 2048  }
  0x24   :  { %2504 = vsyncadd [#allocation4], 4294965248 }
  0x25   :  { %2505 = dma.done.wait [#allocation7], 2048  }
  0x26   :  { %2506 = vsyncadd [#allocation7], 4294965248  ;;  %v2513_v0 = vmov 0   ;;  %v214_v1 = vld [vmem:[%s3337_s0 + $0x10] sm:$0xff]  ;;  %v212_v2 = vld [vmem:[%s3337_s0] sm:$0xff] }
  0x27   :  { %2436 = vset.pattern.permute.xlu1 %v2513_v0  ;;  %2435 = vset.pattern.permute.xlu0 %v2513_v0  ;;  %v196_v3 = vld [vmem:[#allocation3] sm:$0xff]  ;;  %v197_v4 = vld [vmem:[#allocation3 + $0x8] sm:$0xff]  ;;  %v215_v6 = vld [vmem:[%s3337_s0 + $0x18] sm:$0xff] }
  0x28   :  { %289 = vperm.xlu1 %2436, %v214_v1   ;;  %279 = vperm.xlu0 %2435, %v212_v2   ;;  %v2299_v5 = vpack.c.bf16 %v197_v4, %v196_v3  ;;  %v198_v7 = vld [vmem:[#allocation3 + $0x10] sm:$0xff]  ;;  %v199_v8 = vld [vmem:[#allocation3 + $0x18] sm:$0xff]  ;;  %v213_v9 = vld [vmem:[%s3337_s0 + $0x8] sm:$0xff] }
  0x29   :  { %v2303_v10 = vpack.c.bf16 %v199_v8, %v198_v7  ;;  %v200_v11 = vld [vmem:[#allocation3 + $0x20] sm:$0xff]  ;;  %v201_v12 = vld [vmem:[#allocation3 + $0x28] sm:$0xff]  ;;  %v202_v16 = vld [vmem:[#allocation3 + $0x30] sm:$0xff] }
  0x2a   :  { %2300 = vmatprep.subr.bf16.mxu0 %v2299_v5  ;;  %v217_v13 = vld [vmem:[%s3337_s0 + $0x28] sm:$0xff]  ;;  %v2307_v14 = vpack.c.bf16 %v201_v12, %v200_v11  ;;  %v216_v15 = vld [vmem:[%s3337_s0 + $0x20] sm:$0xff]  ;;  %v203_v17 = vld [vmem:[#allocation3 + $0x38] sm:$0xff] }
  0x2b   :  { %2302 = vmatpush3.bf16.msra.mxu0 %v2299_v5  ;;  %v219_v18 = vld [vmem:[%s3337_s0 + $0x38] sm:$0xff]  ;;  %v218_v19 = vld [vmem:[%s3337_s0 + $0x30] sm:$0xff]  ;;  %v2311_v20 = vpack.c.bf16 %v203_v17, %v202_v16  ;;  %v204_v21 = vld [vmem:[#allocation3 + $0x40] sm:$0xff] }
  0x2c   :  { %294 = vperm.xlu1 %2436, %v215_v6   ;;  %284 = vperm.xlu0 %2435, %v213_v9   ;;  %v205_v22 = vld [vmem:[#allocation3 + $0x48] sm:$0xff]  ;;  %v132_v23 = vld [vmem:[%s3339_s2] sm:$0xff]  ;;  %v206_v27 = vld [vmem:[#allocation3 + $0x50] sm:$0xff] }
  0x2d   :  { %2304 = vmatprep.subr.bf16.mxu0 %v2303_v10  ;;  %2075 = vmatprep.mubr.f32.mxu0 %v132_v23  ;;  %v221_v24 = vld [vmem:[%s3337_s0 + $0x48] sm:$0xff]  ;;  %v2315_v25 = vpack.c.bf16 %v205_v22, %v204_v21  ;;  %v220_v26 = vld [vmem:[%s3337_s0 + $0x40] sm:$0xff]  ;;  %v207_v28 = vld [vmem:[#allocation3 + $0x58] sm:$0xff] }
  0x2e   :  { %v223_v29 = vld [vmem:[%s3337_s0 + $0x58] sm:$0xff]  ;;  %v2319_v30 = vpack.c.bf16 %v207_v28, %v206_v27  ;;  %v222_v31 = vld [vmem:[%s3337_s0 + $0x50] sm:$0xff]  ;;  %v208_v32 = vld [vmem:[#allocation3 + $0x60] sm:$0xff] }
  0x2f   :  { %2306 = vmatpush3.bf16.msra.mxu0 %v2303_v10  ;;  %v209_v33 = vld [vmem:[#allocation3 + $0x68] sm:$0xff]  ;;  %v224_v36 = vld [vmem:[%s3337_s0 + $0x60] sm:$0xff]  ;;  %v210_v37 = vld [vmem:[#allocation3 + $0x70] sm:$0xff] }
  0x30   :  { %304 = vperm.xlu1 %2436, %v217_v13   ;;  %299 = vperm.xlu0 %2435, %v216_v15   ;;  %v225_v34 = vld [vmem:[%s3337_s0 + $0x68] sm:$0xff]  ;;  %v2323_v35 = vpack.c.bf16 %v209_v33, %v208_v32  ;;  %v211_v38 = vld [vmem:[#allocation3 + $0x78] sm:$0xff]  ;;  %v226_v41 = vld [vmem:[%s3337_s0 + $0x70] sm:$0xff] }
  0x31   :  { %2308 = vmatprep.subr.bf16.mxu0 %v2307_v14  ;;  %v227_v39 = vld [vmem:[%s3337_s0 + $0x78] sm:$0xff]  ;;  %v2327_v40 = vpack.c.bf16 %v211_v38, %v210_v37  ;;  %v229_v42 = vld [vmem:[%s3337_s0 + $0x88] sm:$0xff]  ;;  %v228_v43 = vld [vmem:[%s3337_s0 + $0x80] sm:$0xff] }
  0x32   :  { %v133_v44 = vld [vmem:[%s3339_s2 + $0x8] sm:$0xff]  ;;  %v231_v45 = vld [vmem:[%s3337_s0 + $0x98] sm:$0xff]  ;;  %v134_v46 = vld [vmem:[%s3339_s2 + $0x10] sm:$0xff] }
  0x33   :  { %2310 = vmatpush3.bf16.msra.mxu0 %v2307_v14  ;;  %v230_v47 = vld [vmem:[%s3337_s0 + $0x90] sm:$0xff]  ;;  %v135_v48 = vld [vmem:[%s3339_s2 + $0x18] sm:$0xff]  ;;  %v233_v49 = vld [vmem:[%s3337_s0 + $0xa8] sm:$0xff] }
  0x34   :  { %314 = vperm.xlu1 %2436, %v219_v18   ;;  %309 = vperm.xlu0 %2435, %v218_v19   ;;  %v136_v50 = vld [vmem:[%s3339_s2 + $0x20] sm:$0xff]  ;;  %v137_v52 = vld [vmem:[%s3339_s2 + $0x28] sm:$0xff]  ;;  %v235_v53 = vld [vmem:[%s3337_s0 + $0xb8] sm:$0xff] }
  0x35   :  { %2312 = vmatprep.subr.bf16.mxu0 %v2311_v20  ;;  %v232_v51 = vld [vmem:[%s3337_s0 + $0xa0] sm:$0xff]  ;;  %v138_v54 = vld [vmem:[%s3339_s2 + $0x30] sm:$0xff]  ;;  %v139_v56 = vld [vmem:[%s3339_s2 + $0x38] sm:$0xff] }
  0x36   :  { %v234_v55 = vld [vmem:[%s3337_s0 + $0xb0] sm:$0xff]  ;;  %v237_v57 = vld [vmem:[%s3337_s0 + $0xc8] sm:$0xff]  ;;  %v140_v58 = vld [vmem:[%s3339_s2 + $0x40] sm:$0xff] }
  0x37   :  { %2314 = vmatpush3.bf16.msra.mxu0 %v2311_v20  ;;  %v236_v59 = vld [vmem:[%s3337_s0 + $0xc0] sm:$0xff]  ;;  %v141_v60 = vld [vmem:[%s3339_s2 + $0x48] sm:$0xff]  ;;  %v239_v61 = vld [vmem:[%s3337_s0 + $0xd8] sm:$0xff] }
  0x38   :  { %324 = vperm.xlu1 %2436, %v221_v24   ;;  %319 = vperm.xlu0 %2435, %v220_v26   ;;  %v142_v62 = vld [vmem:[%s3339_s2 + $0x50] sm:$0xff]  ;;  %v143_v0 = vld [vmem:[%s3339_s2 + $0x58] sm:$0xff]  ;;  %v241_v1 = vld [vmem:[%s3337_s0 + $0xe8] sm:$0xff] }
  0x39   :  { %2316 = vmatprep.subr.bf16.mxu0 %v2315_v25  ;;  %v238_v63 = vld [vmem:[%s3337_s0 + $0xd0] sm:$0xff]  ;;  %v144_v2 = vld [vmem:[%s3339_s2 + $0x60] sm:$0xff]  ;;  %v145_v4 = vld [vmem:[%s3339_s2 + $0x68] sm:$0xff] }
  0x3a   :  { %v240_v3 = vld [vmem:[%s3337_s0 + $0xe0] sm:$0xff]  ;;  %v243_v5 = vld [vmem:[%s3337_s0 + $0xf8] sm:$0xff]  ;;  %v146_v6 = vld [vmem:[%s3339_s2 + $0x70] sm:$0xff] }
  0x3b   :  { %2318 = vmatpush3.bf16.msra.mxu0 %v2315_v25  ;;  %v242_v7 = vld [vmem:[%s3337_s0 + $0xf0] sm:$0xff]  ;;  %v147_v8 = vld [vmem:[%s3339_s2 + $0x78] sm:$0xff]  ;;  %v245_v9 = vld [vmem:[%s3337_s0 + $0x108] sm:$0xff] }
  0x3c   :  { %334 = vperm.xlu1 %2436, %v223_v29   ;;  %329 = vperm.xlu0 %2435, %v222_v31   ;;  %v148_v10 = vld [vmem:[%s3339_s2 + $0x80] sm:$0xff]  ;;  %v149_v12 = vld [vmem:[%s3339_s2 + $0x88] sm:$0xff]  ;;  %v247_v13 = vld [vmem:[%s3337_s0 + $0x118] sm:$0xff] }
  0x3d   :  { %2320 = vmatprep.subr.bf16.mxu0 %v2319_v30  ;;  %v244_v11 = vld [vmem:[%s3337_s0 + $0x100] sm:$0xff]  ;;  %v150_v14 = vld [vmem:[%s3339_s2 + $0x90] sm:$0xff]  ;;  %v151_v16 = vld [vmem:[%s3339_s2 + $0x98] sm:$0xff] }
  0x3e   :  { %v246_v15 = vld [vmem:[%s3337_s0 + $0x110] sm:$0xff]  ;;  %v249_v17 = vld [vmem:[%s3337_s0 + $0x128] sm:$0xff]  ;;  %v152_v18 = vld [vmem:[%s3339_s2 + $0xa0] sm:$0xff] }
  0x3f   :  { %2322 = vmatpush3.bf16.msra.mxu0 %v2319_v30  ;;  %v248_v19 = vld [vmem:[%s3337_s0 + $0x120] sm:$0xff]  ;;  %v153_v20 = vld [vmem:[%s3339_s2 + $0xa8] sm:$0xff]  ;;  %v251_v21 = vld [vmem:[%s3337_s0 + $0x138] sm:$0xff] }
  0x40   :  { %344 = vperm.xlu1 %2436, %v225_v34   ;;  %339 = vperm.xlu0 %2435, %v224_v36   ;;  %v154_v22 = vld [vmem:[%s3339_s2 + $0xb0] sm:$0xff]  ;;  %v155_v24 = vld [vmem:[%s3339_s2 + $0xb8] sm:$0xff]  ;;  %v253_v25 = vld [vmem:[%s3337_s0 + $0x148] sm:$0xff] }
  0x41   :  { %2324 = vmatprep.subr.bf16.mxu0 %v2323_v35  ;;  %v250_v23 = vld [vmem:[%s3337_s0 + $0x130] sm:$0xff]  ;;  %v156_v26 = vld [vmem:[%s3339_s2 + $0xc0] sm:$0xff]  ;;  %v157_v28 = vld [vmem:[%s3339_s2 + $0xc8] sm:$0xff] }
  0x42   :  { %v252_v27 = vld [vmem:[%s3337_s0 + $0x140] sm:$0xff]  ;;  %v255_v29 = vld [vmem:[%s3337_s0 + $0x158] sm:$0xff]  ;;  %v158_v30 = vld [vmem:[%s3339_s2 + $0xd0] sm:$0xff] }
  0x43   :  { %2326 = vmatpush3.bf16.msra.mxu0 %v2323_v35  ;;  %v254_v31 = vld [vmem:[%s3337_s0 + $0x150] sm:$0xff]  ;;  %v159_v32 = vld [vmem:[%s3339_s2 + $0xd8] sm:$0xff]  ;;  %v257_v33 = vld [vmem:[%s3337_s0 + $0x168] sm:$0xff] }
  0x44   :  { %354 = vperm.xlu1 %2436, %v227_v39   ;;  %349 = vperm.xlu0 %2435, %v226_v41   ;;  %v160_v34 = vld [vmem:[%s3339_s2 + $0xe0] sm:$0xff]  ;;  %v161_v36 = vld [vmem:[%s3339_s2 + $0xe8] sm:$0xff]  ;;  %v259_v37 = vld [vmem:[%s3337_s0 + $0x178] sm:$0xff] }
  0x45   :  { %2328 = vmatprep.subr.bf16.mxu0 %v2327_v40  ;;  %v256_v35 = vld [vmem:[%s3337_s0 + $0x160] sm:$0xff]  ;;  %v162_v38 = vld [vmem:[%s3339_s2 + $0xf0] sm:$0xff] }
  0x46   :  { %v258_v39 = vld [vmem:[%s3337_s0 + $0x170] sm:$0xff]  ;;  %v1187_v41 = vld [vmem:[#allocation6] sm:$0xff] }
  0x47   :  { %2330 = vmatpush3.bf16.msra.mxu0 %v2327_v40  ;;  %v163_v40 = vld [vmem:[%s3339_s2 + $0xf8] sm:$0xff] }
  0x48   :  { %364 = vperm.xlu1 %2436, %v229_v42   ;;  %359 = vperm.xlu0 %2435, %v228_v43   ;;  %v1188_v42 = vld [vmem:[#allocation6 + $0x8] sm:$0xff] }
  0x49   :  { %v261_v43 = vld [vmem:[%s3337_s0 + $0x188] sm:$0xff] }
  0x4a   :  { %2076 = vmatmul.mubr.f32.vlgmr.msra.gmra.mrb[0].mxu0 %v133_v44  ;;  %v164_v44 = vld [vmem:[%s3339_s2 + $0x100] sm:$0xff] }
  0x4b   :  { %2078 = vmatprep.mubr.f32.mxu0 %v134_v46  ;;  %v260_v46 = vld [vmem:[%s3337_s0 + $0x180] sm:$0xff] }
  0x4c   :  { %374 = vperm.xlu1 %2436, %v231_v45   ;;  %369 = vperm.xlu0 %2435, %v230_v47   ;;  %v2331_v45 = vpack.c.bf16 %v1188_v42, %v1187_v41  ;;  %v165_v47 = vld [vmem:[%s3339_s2 + $0x108] sm:$0xff]  ;;  %v188_v41 = vld [vmem:[%s3339_s2 + $0x1c0] sm:$0xff] }
  0x4d   :  { %v189_v42 = vld [vmem:[%s3339_s2 + $0x1c8] sm:$0xff] }
  0x4e   :  { %2079 = vmatmul.mubr.f32.gmra.mrb[2].mxu0 %v135_v48  ;;  %2332 = vmatprep.subr.bf16.mxu1 %v2331_v45  ;;  %v1189_v48 = vld [vmem:[#allocation6 + $0x10] sm:$0xff] }
  0x4f   :  { %2081 = vmatprep.mubr.f32.mxu0 %v136_v50  ;;  %v263_v50 = vld [vmem:[%s3337_s0 + $0x198] sm:$0xff]  ;;  %2334 = vmatpush3.bf16.msra.mxu1 %v2331_v45  ;;  %v192_v45 = vld [vmem:[%s3339_s2 + $0x1e0] sm:$0xff] }
  0x50   :  { %384 = vperm.xlu1 %2436, %v233_v49   ;;  %379 = vperm.xlu0 %2435, %v232_v51   ;;  %v1190_v49 = vld [vmem:[#allocation6 + $0x18] sm:$0xff]  ;;  %v166_v51 = vld [vmem:[%s3339_s2 + $0x110] sm:$0xff] }
  0x52   :  { %2082 = vmatmul.mubr.f32.gmra.mrb[4].mxu0 %v137_v52  ;;  %v2335_v52 = vpack.c.bf16 %v1190_v49, %v1189_v48  ;;  %v195_v48 = vld [vmem:[%s3339_s2 + $0x1f8] sm:$0xff] }
  0x53   :  { %2084 = vmatprep.mubr.f32.mxu0 %v138_v54  ;;  %v167_v54 = vld [vmem:[%s3339_s2 + $0x118] sm:$0xff] }
  0x54   :  { %394 = vperm.xlu1 %2436, %v235_v53   ;;  %389 = vperm.xlu0 %2435, %v234_v55   ;;  %v262_v53 = vld [vmem:[%s3337_s0 + $0x190] sm:$0xff]  ;;  %v1191_v55 = vld [vmem:[#allocation6 + $0x20] sm:$0xff] }
  0x55   :  { %2336 = vmatprep.subr.bf16.mxu1 %v2335_v52 }
  0x56   :  { %2085 = vmatmul.mubr.f32.gmra.mrb[6].mxu0 %v139_v56  ;;  %v1192_v56 = vld [vmem:[#allocation6 + $0x28] sm:$0xff]  ;;  %2338 = vmatpush3.bf16.msra.mxu1 %v2335_v52 }
  0x57   :  { %2087 = vmatprep.mubr.f32.mxu0 %v140_v58  ;;  %v168_v58 = vld [vmem:[%s3339_s2 + $0x120] sm:$0xff] }
  0x58   :  { %404 = vperm.xlu1 %2436, %v237_v57   ;;  %399 = vperm.xlu0 %2435, %v236_v59   ;;  %v265_v57 = vld [vmem:[%s3337_s0 + $0x1a8] sm:$0xff]  ;;  %v2339_v59 = vpack.c.bf16 %v1192_v56, %v1191_v55 }
  0x5a   :  { %2088 = vmatmul.mubr.f32.gmra.mrb[8].mxu0 %v141_v60  ;;  %v264_v60 = vld [vmem:[%s3337_s0 + $0x1a0] sm:$0xff]  ;;  %2340 = vmatprep.subr.bf16.mxu1 %v2339_v59 }
  0x5b   :  { %2090 = vmatprep.mubr.f32.mxu0 %v142_v62  ;;  %v1193_v62 = vld [vmem:[#allocation6 + $0x30] sm:$0xff]  ;;  %2342 = vmatpush3.bf16.msra.mxu1 %v2339_v59 }
  0x5c   :  { %414 = vperm.xlu1 %2436, %v239_v61   ;;  %409 = vperm.xlu0 %2435, %v238_v63   ;;  %v169_v61 = vld [vmem:[%s3339_s2 + $0x128] sm:$0xff]  ;;  %v1194_v63 = vld [vmem:[#allocation6 + $0x38] sm:$0xff] }
  0x5e   :  { %2091 = vmatmul.mubr.f32.gmra.mrb[10].mxu0 %v143_v0  ;;  %v267_v0 = vld [vmem:[%s3337_s0 + $0x1b8] sm:$0xff] }
  0x5f   :  { %2093 = vmatprep.mubr.f32.mxu0 %v144_v2  ;;  %v2343_v2 = vpack.c.bf16 %v1194_v63, %v1193_v62 }
  0x60   :  { %424 = vperm.xlu1 %2436, %v241_v1   ;;  %419 = vperm.xlu0 %2435, %v240_v3   ;;  %v170_v1 = vld [vmem:[%s3339_s2 + $0x130] sm:$0xff] }
  0x61   :  { %v266_v3 = vld [vmem:[%s3337_s0 + $0x1b0] sm:$0xff]  ;;  %2344 = vmatprep.subr.bf16.mxu1 %v2343_v2 }
  0x62   :  { %2094 = vmatmul.mubr.f32.gmra.mrb[12].mxu0 %v145_v4  ;;  %v171_v4 = vld [vmem:[%s3339_s2 + $0x138] sm:$0xff]  ;;  %2346 = vmatpush3.bf16.msra.mxu1 %v2343_v2 }
  0x63   :  { %2096 = vmatprep.mubr.f32.mxu0 %v146_v6  ;;  %v1196_v6 = vld [vmem:[#allocation6 + $0x48] sm:$0xff] }
  0x64   :  { %434 = vperm.xlu1 %2436, %v243_v5   ;;  %429 = vperm.xlu0 %2435, %v242_v7   ;;  %v1195_v5 = vld [vmem:[#allocation6 + $0x40] sm:$0xff]  ;;  %v269_v7 = vld [vmem:[%s3337_s0 + $0x1c8] sm:$0xff] }
  0x66   :  { %2097 = vmatmul.mubr.f32.gmra.mrb[14].mxu0 %v147_v8  ;;  %v172_v8 = vld [vmem:[%s3339_s2 + $0x140] sm:$0xff] }
  0x67   :  { %2099 = vmatprep.mubr.f32.mxu0 %v148_v10  ;;  %v268_v10 = vld [vmem:[%s3337_s0 + $0x1c0] sm:$0xff] }
  0x68   :  { %444 = vperm.xlu1 %2436, %v245_v9   ;;  %439 = vperm.xlu0 %2435, %v244_v11   ;;  %v2347_v9 = vpack.c.bf16 %v1196_v6, %v1195_v5  ;;  %v173_v11 = vld [vmem:[%s3339_s2 + $0x148] sm:$0xff] }
  0x6a   :  { %2100 = vmatmul.mubr.f32.gmra.mrb[16].mxu0 %v149_v12  ;;  %2348 = vmatprep.subr.bf16.mxu1 %v2347_v9  ;;  %v1197_v12 = vld [vmem:[#allocation6 + $0x50] sm:$0xff] }
  0x6b   :  { %2102 = vmatprep.mubr.f32.mxu0 %v150_v14  ;;  %v271_v14 = vld [vmem:[%s3337_s0 + $0x1d8] sm:$0xff]  ;;  %2350 = vmatpush3.bf16.msra.mxu1 %v2347_v9 }
  0x6c   :  { %454 = vperm.xlu1 %2436, %v247_v13   ;;  %449 = vperm.xlu0 %2435, %v246_v15   ;;  %v1198_v13 = vld [vmem:[#allocation6 + $0x58] sm:$0xff]  ;;  %v174_v15 = vld [vmem:[%s3339_s2 + $0x150] sm:$0xff] }
  0x6e   :  { %2103 = vmatmul.mubr.f32.gmra.mrb[18].mxu0 %v151_v16  ;;  %v2351_v16 = vpack.c.bf16 %v1198_v13, %v1197_v12  ;;  %v3007_v12 = vld [vmem:[%s3342_s5] ss:$0 sm:$0xff] }
  0x6f   :  { %2105 = vmatprep.mubr.f32.mxu0 %v152_v18  ;;  %v175_v18 = vld [vmem:[%s3339_s2 + $0x158] sm:$0xff] }
  0x70   :  { %464 = vperm.xlu1 %2436, %v249_v17   ;;  %459 = vperm.xlu0 %2435, %v248_v19   ;;  %v270_v17 = vld [vmem:[%s3337_s0 + $0x1d0] sm:$0xff]  ;;  %v1199_v19 = vld [vmem:[#allocation6 + $0x60] sm:$0xff] }
  0x71   :  { %2352 = vmatprep.subr.bf16.mxu1 %v2351_v16 }
  0x72   :  { %2106 = vmatmul.mubr.f32.gmra.mrb[20].mxu0 %v153_v20  ;;  %v1200_v20 = vld [vmem:[#allocation6 + $0x68] sm:$0xff]  ;;  %2354 = vmatpush3.bf16.msra.mxu1 %v2351_v16 }
  0x73   :  { %2108 = vmatprep.mubr.f32.mxu0 %v154_v22  ;;  %v176_v22 = vld [vmem:[%s3339_s2 + $0x160] sm:$0xff] }
  0x74   :  { %474 = vperm.xlu1 %2436, %v251_v21   ;;  %469 = vperm.xlu0 %2435, %v250_v23   ;;  %v273_v21 = vld [vmem:[%s3337_s0 + $0x1e8] sm:$0xff]  ;;  %v2355_v23 = vpack.c.bf16 %v1200_v20, %v1199_v19 }
  0x76   :  { %2109 = vmatmul.mubr.f32.gmra.mrb[22].mxu0 %v155_v24  ;;  %v272_v24 = vld [vmem:[%s3337_s0 + $0x1e0] sm:$0xff]  ;;  %2356 = vmatprep.subr.bf16.mxu1 %v2355_v23 }
  0x77   :  { %2111 = vmatprep.mubr.f32.mxu0 %v156_v26  ;;  %v1201_v26 = vld [vmem:[#allocation6 + $0x70] sm:$0xff]  ;;  %2358 = vmatpush3.bf16.msra.mxu1 %v2355_v23 }
  0x78   :  { %484 = vperm.xlu1 %2436, %v253_v25   ;;  %479 = vperm.xlu0 %2435, %v252_v27   ;;  %v177_v25 = vld [vmem:[%s3339_s2 + $0x168] sm:$0xff]  ;;  %v1202_v27 = vld [vmem:[#allocation6 + $0x78] sm:$0xff] }
  0x7a   :  { %2112 = vmatmul.mubr.f32.gmra.mrb[24].mxu0 %v157_v28  ;;  %v275_v28 = vld [vmem:[%s3337_s0 + $0x1f8] sm:$0xff] }
  0x7b   :  { %2114 = vmatprep.mubr.f32.mxu0 %v158_v30  ;;  %v2359_v30 = vpack.c.bf16 %v1202_v27, %v1201_v26 }
  0x7c   :  { %494 = vperm.xlu1 %2436, %v255_v29   ;;  %489 = vperm.xlu0 %2435, %v254_v31   ;;  %v178_v29 = vld [vmem:[%s3339_s2 + $0x170] sm:$0xff] }
  0x7d   :  { %v274_v31 = vld [vmem:[%s3337_s0 + $0x1f0] sm:$0xff]  ;;  %2360 = vmatprep.subr.bf16.mxu1 %v2359_v30 }
  0x7e   :  { %2115 = vmatmul.mubr.f32.gmra.mrb[26].mxu0 %v159_v32  ;;  %v179_v32 = vld [vmem:[%s3339_s2 + $0x178] sm:$0xff]  ;;  %2362 = vmatpush3.bf16.msra.mxu1 %v2359_v30 }
  0x7f   :  { %2117 = vmatprep.mubr.f32.mxu0 %v160_v34  ;;  %v181_v34 = vld [vmem:[%s3339_s2 + $0x188] sm:$0xff] }
  0x80   :  { %504 = vperm.xlu1 %2436, %v257_v33   ;;  %499 = vperm.xlu0 %2435, %v256_v35   ;;  %v180_v33 = vld [vmem:[%s3339_s2 + $0x180] sm:$0xff]  ;;  %v182_v35 = vld [vmem:[%s3339_s2 + $0x190] sm:$0xff] }
  0x82   :  { %2118 = vmatmul.mubr.f32.gmra.mrb[28].mxu0 %v161_v36  ;;  %v183_v36 = vld [vmem:[%s3339_s2 + $0x198] sm:$0xff] }
  0x83   :  { %2120 = vmatprep.mubr.f32.mxu0 %v162_v38  ;;  %v185_v38 = vld [vmem:[%s3339_s2 + $0x1a8] sm:$0xff] }
  0x84   :  { %514 = vperm.xlu1 %2436, %v259_v37   ;;  %509 = vperm.xlu0 %2435, %v258_v39   ;;  %v184_v37 = vld [vmem:[%s3339_s2 + $0x1a0] sm:$0xff]  ;;  %v186_v39 = vld [vmem:[%s3339_s2 + $0x1b0] sm:$0xff] }
  0x86   :  { %2121 = vmatmul.mubr.f32.gmra.mrb[30].mxu0 %v163_v40  ;;  %v187_v40 = vld [vmem:[%s3339_s2 + $0x1b8] sm:$0xff] }
  0x87   :  { %2123 = vmatprep.mubr.f32.mxu0 %v164_v44  ;;  %v191_v44 = vld [vmem:[%s3339_s2 + $0x1d8] sm:$0xff] }
  0x88   :  { %524 = vperm.xlu1 %2436, %v261_v43   ;;  %519 = vperm.xlu0 %2435, %v260_v46   ;;  %v190_v43 = vld [vmem:[%s3339_s2 + $0x1d0] sm:$0xff]  ;;  %v193_v46 = vld [vmem:[%s3339_s2 + $0x1e8] sm:$0xff] }
  0x8a   :  { %2124 = vmatmul.mubr.f32.gmra.mrb[32].mxu0 %v165_v47  ;;  %v194_v47 = vld [vmem:[%s3339_s2 + $0x1f0] sm:$0xff] }
  0x8b   :  { %2126 = vmatprep.mubr.f32.mxu0 %v166_v51 }
  0x8c   :  { %534 = vperm.xlu1 %2436, %v263_v50   ;;  %529 = vperm.xlu0 %2435, %v262_v53  }
  0x8e   :  { %2127 = vmatmul.mubr.f32.gmra.mrb[34].mxu0 %v167_v54 }
  0x8f   :  { %2129 = vmatprep.mubr.f32.mxu0 %v168_v58 }
  0x90   :  { %544 = vperm.xlu1 %2436, %v265_v57   ;;  %539 = vperm.xlu0 %2435, %v264_v60  }
  0x92   :  { %2130 = vmatmul.mubr.f32.gmra.mrb[36].mxu0 %v169_v61 }
  0x93   :  { %2132 = vmatprep.mubr.f32.mxu0 %v170_v1 }
  0x94   :  { %554 = vperm.xlu1 %2436, %v267_v0   ;;  %549 = vperm.xlu0 %2435, %v266_v3  }
  0x96   :  { %2133 = vmatmul.mubr.f32.gmra.mrb[38].mxu0 %v171_v4 }
  0x97   :  { %2135 = vmatprep.mubr.f32.mxu0 %v172_v8 }
  0x98   :  { %564 = vperm.xlu1 %2436, %v269_v7   ;;  %559 = vperm.xlu0 %2435, %v268_v10   ;;  %v2998_v7 = vld [vmem:[%s3341_s4] ss:$0 sm:$0xff] }
  0x9a   :  { %2136 = vmatmul.mubr.f32.gmra.mrb[40].mxu0 %v173_v11 }
  0x9b   :  { %2138 = vmatprep.mubr.f32.mxu0 %v174_v15 }
  0x9c   :  { %574 = vperm.xlu1 %2436, %v271_v14   ;;  %569 = vperm.xlu0 %2435, %v270_v17  }
  0x9e   :  { %2139 = vmatmul.mubr.f32.gmra.mrb[42].mxu0 %v175_v18 }
  0x9f   :  { %2141 = vmatprep.mubr.f32.mxu0 %v176_v22 }
  0xa0   :  { %584 = vperm.xlu1 %2436, %v273_v21   ;;  %579 = vperm.xlu0 %2435, %v272_v24  }
  0xa2   :  { %2142 = vmatmul.mubr.f32.gmra.mrb[44].mxu0 %v177_v25 }
  0xa3   :  { %2144 = vmatprep.mubr.f32.mxu0 %v178_v29 }
  0xa4   :  { %594 = vperm.xlu1 %2436, %v275_v28   ;;  %589 = vperm.xlu0 %2435, %v274_v31  }
  0xa6   :  { %2145 = vmatmul.mubr.f32.gmra.mrb[46].mxu0 %v179_v32 }
  0xa7   :  { %2147 = vmatprep.mubr.f32.mxu0 %v180_v33  ;;  %v290_v49 = vpop.permute.xlu1 %289  ;;  %v280_v50 = vpop.permute.xlu0 %279 }
  0xa8   :  { %v603_v9 = vmul.f32 %v2998_v7, %v280_v50  ;;  %v605_v19 = vmul.f32 %v2998_v7, %v290_v49 }
  0xaa   :  { %2148 = vmatmul.mubr.f32.gmra.mrb[48].mxu0 %v181_v34 }
  0xab   :  { %2150 = vmatprep.mubr.f32.mxu0 %v182_v35  ;;  %v295_v51 = vpop.permute.xlu1 %294  ;;  %v285_v52 = vpop.permute.xlu0 %284 }
  0xac   :  { %v604_v8 = vmul.f32 %v2998_v7, %v285_v52  ;;  %v606_v17 = vmul.f32 %v2998_v7, %v295_v51 }
  0xae   :  { %2151 = vmatmul.mubr.f32.gmra.mrb[50].mxu0 %v183_v36 }
  0xaf   :  { %2153 = vmatprep.mubr.f32.mxu0 %v184_v37  ;;  %v305_v53 = vpop.permute.xlu1 %304  ;;  %v300_v54 = vpop.permute.xlu0 %299 }
  0xb0   :  { %v608_v27 = vmul.f32 %v2998_v7, %v305_v53  ;;  %v607_v31 = vmul.f32 %v2998_v7, %v300_v54 }
  0xb2   :  { %2154 = vmatmul.mubr.f32.gmra.mrb[52].mxu0 %v185_v38 }
  0xb3   :  { %2156 = vmatprep.mubr.f32.mxu0 %v186_v39  ;;  %v315_v55 = vpop.permute.xlu1 %314  ;;  %v310_v56 = vpop.permute.xlu0 %309 }
  0xb4   :  { %v610_v38 = vmul.f32 %v2998_v7, %v315_v55 }
  0xb6   :  { %2157 = vmatmul.mubr.f32.gmra.mrb[54].mxu0 %v187_v40 }
  0xb7   :  { %2159 = vmatprep.mubr.f32.mxu0 %v188_v41  ;;  %v325_v57 = vpop.permute.xlu1 %324  ;;  %v2969_v58 = vpop.permute.xlu0 %319  ;;  %v609_v41 = vmul.f32 %v2998_v7, %v310_v56 }
  0xb8   :  { %v612_v50 = vmul.f32 %v2998_v7, %v325_v57  ;;  %v611_v53 = vmul.f32 %v2998_v7, %v2969_v58 }
  0xba   :  { %2160 = vmatmul.mubr.f32.gmra.mrb[56].mxu0 %v189_v42 }
  0xbb   :  { %2162 = vmatprep.mubr.f32.mxu0 %v190_v43  ;;  %v2971_v59 = vpop.permute.xlu1 %334  ;;  %v2973_v60 = vpop.permute.xlu0 %329 }
  0xbc   :  { %v614_v57 = vmul.f32 %v2998_v7, %v2971_v59  ;;  %v613_v58 = vmul.f32 %v2998_v7, %v2973_v60 }
  0xbe   :  { %2163 = vmatmul.mubr.f32.gmra.mrb[58].mxu0 %v191_v44 }
  0xbf   :  { %2165 = vmatprep.mubr.f32.mxu0 %v192_v45  ;;  %v2975_v61 = vpop.permute.xlu1 %344  ;;  %v2977_v62 = vpop.permute.xlu0 %339 }
  0xc0   :  { %v616_v59 = vmul.f32 %v2998_v7, %v2975_v61 }
  0xc2   :  { %2166 = vmatmul.mubr.f32.gmra.mrb[60].mxu0 %v193_v46 }
  0xc3   :  { %2168 = vmatprep.mubr.f32.mxu0 %v194_v47  ;;  %v2979_v63 = vpop.permute.xlu1 %354  ;;  %v2981_v0 = vpop.permute.xlu0 %349 }
  0xc4   :  { %v618_v61 = vmul.f32 %v2998_v7, %v2979_v63 }
  0xc6   :  { %2169 = vmatmul.mubr.f32.gmra.mrb[62].mxu0 %v195_v48 }
  0xc7   :  { %v2983_v1 = vpop.permute.xlu1 %364  ;;  %v2985_v2 = vpop.permute.xlu0 %359 }
  0xc8   :  { %v620_v63 = vmul.f32 %v2998_v7, %v2983_v1 }
  0xcb   :  { %v2987_v3 = vpop.permute.xlu1 %374  ;;  %v2989_v4 = vpop.permute.xlu0 %369 }
  0xcc   :  { %v622_v1 = vmul.f32 %v2998_v7, %v2987_v3 }
  0xcf   :  { %v2991_v5 = vpop.permute.xlu1 %384  ;;  %v2993_v6 = vpop.permute.xlu0 %379 }
  0xd0   :  { %v624_v3 = vmul.f32 %v2998_v7, %v2991_v5 }
  0xd3   :  { %v3002_v10 = vpop.permute.xlu1 %394  ;;  %v3009_v13 = vpop.permute.xlu0 %389 }
  0xd4   :  { %v626_v5 = vmul.f32 %v2998_v7, %v3002_v10 }
  0xd7   :  { %v3015_v24 = vpop.permute.xlu1 %404  ;;  %v3018_v28 = vpop.permute.xlu0 %399 }
  0xd8   :  { %v628_v10 = vmul.f32 %v2998_v7, %v3015_v24 }
  0xdb   :  { %v3026_v42 = vpop.permute.xlu1 %414  ;;  %v3029_v45 = vpop.permute.xlu0 %409 }
  0xdc   :  { %v630_v24 = vmul.f32 %v2998_v7, %v3026_v42 }
 0x11d   :  { %v2077_v11 = vpop.f32.mrb[0].mxu0 }
 0x11e   :  { %v739_v14 = vadd.f32 %v2077_v11, %v604_v8  ;;  %v733_v15 = vpop.f32.mrb[1].mxu0 }
 0x11f   :  { %v734_v16 = vadd.f32 %v733_v15, %v603_v9  ;;  %v3036_v9 = vpop.permute.xlu1 %424  ;;  %v3040_v15 = vpop.permute.xlu0 %419 }
 0x120   :  { %v1060_v18 = vadd.f32 %v3007_v12, %v739_v14  ;;  %v632_v42 = vmul.f32 %v2998_v7, %v3036_v9 }
 0x121   :  { %v2080_v20 = vpop.f32.mrb[2].mxu0  ;;  %v1059_v21 = vadd.f32 %v3007_v12, %v734_v16 }
 0x122   :  { %v749_v22 = vadd.f32 %v2080_v20, %v606_v17  ;;  %v743_v23 = vpop.f32.mrb[3].mxu0  ;;  %v1124_v29 = vmax.f32 %v1060_v18, 0.0 }
 0x123   :  { %v744_v25 = vadd.f32 %v743_v23, %v605_v19  ;;  %v1123_v26 = vmax.f32 %v1059_v21, 0.0 }
 0x124   :  { %v1062_v30 = vadd.f32 %v3007_v12, %v749_v22 }
 0x125   :  { %v1061_v32 = vadd.f32 %v3007_v12, %v744_v25  ;;  %v2083_v33 = vpop.f32.mrb[4].mxu0  ;;  %2203 = vmatprep.mubr.f32.mxu1 %v1123_v26 }
 0x126   :  { %v759_v34 = vadd.f32 %v2083_v33, %v608_v27  ;;  %v753_v35 = vpop.f32.mrb[5].mxu0  ;;  %2204 = vmatmul.mubr.f32.vlgmr.msra.gmra.mrb[0].mxu1 %v1124_v29  ;;  %v1126_v39 = vmax.f32 %v1062_v30, 0.0  ;;  %v615_v27 = vmul.f32 %v2998_v7, %v2977_v62  ;;  %v3051_v29 = vpop.permute.xlu1 %434  ;;  %v617_v62 = vmul.f32 %v2998_v7, %v2981_v0 }
 0x127   :  { %v1125_v36 = vmax.f32 %v1061_v32, 0.0  ;;  %v754_v37 = vadd.f32 %v753_v35, %v607_v31  ;;  %v3054_v31 = vpop.permute.xlu0 %429  ;;  %v619_v0 = vmul.f32 %v2998_v7, %v2985_v2  ;;  %v634_v9 = vmul.f32 %v2998_v7, %v3051_v29 }
 0x128   :  { %v1064_v40 = vadd.f32 %v3007_v12, %v759_v34 }
 0x129   :  { %v1063_v43 = vadd.f32 %v3007_v12, %v754_v37  ;;  %v2086_v44 = vpop.f32.mrb[6].mxu0  ;;  %2206 = vmatprep.mubr.f32.mxu1 %v1125_v36 }
 0x12a   :  { %v769_v46 = vadd.f32 %v2086_v44, %v610_v38  ;;  %v763_v47 = vpop.f32.mrb[7].mxu0  ;;  %2207 = vmatmul.mubr.f32.gmra.mrb[2].mxu1 %v1126_v39  ;;  %v1128_v51 = vmax.f32 %v1064_v40, 0.0 }
 0x12b   :  { %v1127_v48 = vmax.f32 %v1063_v43, 0.0  ;;  %v764_v49 = vadd.f32 %v763_v47, %v609_v41  ;;  %v3062_v43 = vpop.permute.xlu1 %444  ;;  %v3066_v47 = vpop.permute.xlu0 %439 }
 0x12c   :  { %v1066_v52 = vadd.f32 %v3007_v12, %v769_v46  ;;  %v636_v29 = vmul.f32 %v2998_v7, %v3062_v43 }
 0x12d   :  { %v1065_v54 = vadd.f32 %v3007_v12, %v764_v49  ;;  %v2089_v55 = vpop.f32.mrb[8].mxu0  ;;  %2209 = vmatprep.mubr.f32.mxu1 %v1127_v48 }
 0x12e   :  { %v779_v56 = vadd.f32 %v2089_v55, %v612_v50  ;;  %v773_v8 = vpop.f32.mrb[9].mxu0  ;;  %2210 = vmatmul.mubr.f32.gmra.mrb[4].mxu1 %v1128_v51  ;;  %v1130_v16 = vmax.f32 %v1066_v52, 0.0 }
 0x12f   :  { %v1129_v11 = vmax.f32 %v1065_v54, 0.0  ;;  %v774_v14 = vadd.f32 %v773_v8, %v611_v53 }
 0x130   :  { %v1068_v17 = vadd.f32 %v3007_v12, %v779_v56 }
 0x131   :  { %v1067_v18 = vadd.f32 %v3007_v12, %v774_v14  ;;  %v2092_v19 = vpop.f32.mrb[10].mxu0  ;;  %2212 = vmatprep.mubr.f32.mxu1 %v1129_v11  ;;  %v621_v11 = vmul.f32 %v2998_v7, %v2989_v4  ;;  %v3077_v14 = vpop.permute.xlu1 %454  ;;  %v623_v4 = vmul.f32 %v2998_v7, %v2993_v6  ;;  %v625_v6 = vmul.f32 %v2998_v7, %v3009_v13 }
 0x132   :  { %v789_v20 = vadd.f32 %v2092_v19, %v614_v57  ;;  %v783_v21 = vpop.f32.mrb[11].mxu0  ;;  %2213 = vmatmul.mubr.f32.gmra.mrb[6].mxu1 %v1130_v16  ;;  %v1132_v25 = vmax.f32 %v1068_v17, 0.0  ;;  %v3080_v16 = vpop.permute.xlu0 %449  ;;  %v638_v43 = vmul.f32 %v2998_v7, %v3077_v14 }
 0x133   :  { %v1131_v22 = vmax.f32 %v1067_v18, 0.0  ;;  %v784_v23 = vadd.f32 %v783_v21, %v613_v58 }
 0x134   :  { %v1070_v26 = vadd.f32 %v3007_v12, %v789_v20 }
 0x135   :  { %v1069_v60 = vadd.f32 %v3007_v12, %v784_v23  ;;  %v2095_v30 = vpop.f32.mrb[12].mxu0  ;;  %2215 = vmatprep.mubr.f32.mxu1 %v1131_v22 }
 0x136   :  { %v799_v32 = vadd.f32 %v2095_v30, %v616_v59  ;;  %v793_v33 = vpop.f32.mrb[13].mxu0  ;;  %2216 = vmatmul.mubr.f32.gmra.mrb[8].mxu1 %v1132_v25  ;;  %v1134_v36 = vmax.f32 %v1070_v26, 0.0  ;;  %v3088_v26 = vpop.permute.xlu1 %464 }
 0x137   :  { %v1133_v34 = vmax.f32 %v1069_v60, 0.0  ;;  %v794_v35 = vadd.f32 %v793_v33, %v615_v27  ;;  %v3092_v30 = vpop.permute.xlu0 %459  ;;  %v640_v14 = vmul.f32 %v2998_v7, %v3088_v26 }
 0x138   :  { %v1072_v37 = vadd.f32 %v3007_v12, %v799_v32 }
 0x139   :  { %v1071_v38 = vadd.f32 %v3007_v12, %v794_v35  ;;  %v2098_v39 = vpop.f32.mrb[14].mxu0  ;;  %2218 = vmatprep.mubr.f32.mxu1 %v1133_v34 }
 0x13a   :  { %v809_v40 = vadd.f32 %v2098_v39, %v618_v61  ;;  %v803_v41 = vpop.f32.mrb[15].mxu0  ;;  %2219 = vmatmul.mubr.f32.gmra.mrb[10].mxu1 %v1134_v36  ;;  %v1136_v48 = vmax.f32 %v1072_v37, 0.0 }
 0x13b   :  { %v1135_v44 = vmax.f32 %v1071_v38, 0.0  ;;  %v804_v46 = vadd.f32 %v803_v41, %v617_v62  ;;  %v3103_v41 = vpop.permute.xlu1 %474 }
 0x13c   :  { %v1074_v49 = vadd.f32 %v3007_v12, %v809_v40  ;;  %v627_v40 = vmul.f32 %v2998_v7, %v3018_v28  ;;  %v629_v28 = vmul.f32 %v2998_v7, %v3029_v45  ;;  %v631_v45 = vmul.f32 %v2998_v7, %v3040_v15 }
 0x13d   :  { %v1073_v50 = vadd.f32 %v3007_v12, %v804_v46  ;;  %v2101_v51 = vpop.f32.mrb[16].mxu0  ;;  %2221 = vmatprep.mubr.f32.mxu1 %v1135_v44  ;;  %v3106_v46 = vpop.permute.xlu0 %469  ;;  %v642_v26 = vmul.f32 %v2998_v7, %v3103_v41 }
 0x13e   :  { %v819_v52 = vadd.f32 %v2101_v51, %v620_v63  ;;  %v813_v53 = vpop.f32.mrb[17].mxu0  ;;  %2222 = vmatmul.mubr.f32.gmra.mrb[12].mxu1 %v1136_v48  ;;  %v1138_v56 = vmax.f32 %v1074_v49, 0.0 }
 0x13f   :  { %v1137_v54 = vmax.f32 %v1073_v50, 0.0  ;;  %v814_v55 = vadd.f32 %v813_v53, %v619_v0 }
 0x140   :  { %v1076_v8 = vadd.f32 %v3007_v12, %v819_v52 }
 0x141   :  { %v1075_v2 = vadd.f32 %v3007_v12, %v814_v55  ;;  %v2104_v57 = vpop.f32.mrb[18].mxu0  ;;  %2224 = vmatprep.mubr.f32.mxu1 %v1137_v54 }
 0x142   :  { %v829_v17 = vadd.f32 %v2104_v57, %v622_v1  ;;  %v823_v58 = vpop.f32.mrb[19].mxu0  ;;  %2225 = vmatmul.mubr.f32.gmra.mrb[14].mxu1 %v1138_v56  ;;  %v1140_v20 = vmax.f32 %v1076_v8, 0.0  ;;  %v3114_v1 = vpop.permute.xlu1 %484 }
 0x143   :  { %v1139_v18 = vmax.f32 %v1075_v2, 0.0  ;;  %v824_v19 = vadd.f32 %v823_v58, %v621_v11  ;;  %v3118_v11 = vpop.permute.xlu0 %479 }
 0x144   :  { %v1078_v21 = vadd.f32 %v3007_v12, %v829_v17 }
 0x145   :  { %v1077_v22 = vadd.f32 %v3007_v12, %v824_v19  ;;  %v2107_v23 = vpop.f32.mrb[20].mxu0  ;;  %2227 = vmatprep.mubr.f32.mxu1 %v1139_v18 }
 0x146   :  { %v839_v59 = vadd.f32 %v2107_v23, %v624_v3  ;;  %v833_v25 = vpop.f32.mrb[21].mxu0  ;;  %2228 = vmatmul.mubr.f32.gmra.mrb[16].mxu1 %v1140_v20  ;;  %v1142_v32 = vmax.f32 %v1078_v21, 0.0  ;;  %v3129_v23 = vpop.permute.xlu1 %494 }
 0x147   :  { %v1141_v27 = vmax.f32 %v1077_v22, 0.0  ;;  %v834_v60 = vadd.f32 %v833_v25, %v623_v4  ;;  %v633_v22 = vmul.f32 %v2998_v7, %v3054_v31  ;;  %v3132_v25 = vpop.permute.xlu0 %489  ;;  %v635_v31 = vmul.f32 %v2998_v7, %v3066_v47 }
 0x148   :  { %v1080_v33 = vadd.f32 %v3007_v12, %v839_v59  ;;  %v637_v47 = vmul.f32 %v2998_v7, %v3080_v16 }
 0x149   :  { %v1079_v34 = vadd.f32 %v3007_v12, %v834_v60  ;;  %v2110_v35 = vpop.f32.mrb[22].mxu0  ;;  %2230 = vmatprep.mubr.f32.mxu1 %v1141_v27 }
 0x14a   :  { %v849_v61 = vadd.f32 %v2110_v35, %v626_v5  ;;  %v843_v36 = vpop.f32.mrb[23].mxu0  ;;  %2231 = vmatmul.mubr.f32.gmra.mrb[18].mxu1 %v1142_v32  ;;  %v1144_v38 = vmax.f32 %v1080_v33, 0.0 }
 0x14b   :  { %v1143_v37 = vmax.f32 %v1079_v34, 0.0  ;;  %v844_v62 = vadd.f32 %v843_v36, %v625_v6 }
 0x14c   :  { %v1082_v39 = vadd.f32 %v3007_v12, %v849_v61 }
 0x14d   :  { %v1081_v13 = vadd.f32 %v3007_v12, %v844_v62  ;;  %v2113_v44 = vpop.f32.mrb[24].mxu0  ;;  %2233 = vmatprep.mubr.f32.mxu1 %v1143_v37  ;;  %v3140_v37 = vpop.permute.xlu1 %504 }
 0x14e   :  { %v859_v63 = vadd.f32 %v2113_v44, %v628_v10  ;;  %v853_v48 = vpop.f32.mrb[25].mxu0  ;;  %2234 = vmatmul.mubr.f32.gmra.mrb[20].mxu1 %v1144_v38  ;;  %v1146_v50 = vmax.f32 %v1082_v39, 0.0  ;;  %v3144_v38 = vpop.permute.xlu0 %499 }
 0x14f   :  { %v1145_v49 = vmax.f32 %v1081_v13, 0.0  ;;  %v854_v0 = vadd.f32 %v853_v48, %v627_v40 }
 0x150   :  { %v1084_v51 = vadd.f32 %v3007_v12, %v859_v63 }
 0x151   :  { %v1083_v52 = vadd.f32 %v3007_v12, %v854_v0  ;;  %v2116_v53 = vpop.f32.mrb[26].mxu0  ;;  %2236 = vmatprep.mubr.f32.mxu1 %v1145_v49 }
 0x152   :  { %v869_v54 = vadd.f32 %v2116_v53, %v630_v24  ;;  %v863_v55 = vpop.f32.mrb[27].mxu0  ;;  %2237 = vmatmul.mubr.f32.gmra.mrb[22].mxu1 %v1146_v50  ;;  %v1148_v2 = vmax.f32 %v1084_v51, 0.0  ;;  %v639_v51 = vmul.f32 %v2998_v7, %v3092_v30  ;;  %v3158_v53 = vpop.permute.xlu0 %509  ;;  %v641_v30 = vmul.f32 %v2998_v7, %v3106_v46 }
 0x153   :  { %v1147_v56 = vmax.f32 %v1083_v52, 0.0  ;;  %v864_v8 = vadd.f32 %v863_v55, %v629_v28  ;;  %v3155_v28 = vpop.permute.xlu1 %514  ;;  %v643_v46 = vmul.f32 %v2998_v7, %v3118_v11 }
 0x154   :  { %v1086_v57 = vadd.f32 %v3007_v12, %v869_v54 }
 0x155   :  { %v1085_v17 = vadd.f32 %v3007_v12, %v864_v8  ;;  %v2119_v58 = vpop.f32.mrb[28].mxu0  ;;  %2239 = vmatprep.mubr.f32.mxu1 %v1147_v56 }
 0x156   :  { %v879_v18 = vadd.f32 %v2119_v58, %v632_v42  ;;  %v873_v19 = vpop.f32.mrb[29].mxu0  ;;  %2240 = vmatmul.mubr.f32.gmra.mrb[24].mxu1 %v1148_v2  ;;  %v1150_v21 = vmax.f32 %v1086_v57, 0.0  ;;  %v520_v41 = vpop.permute.xlu0 %519 }
 0x157   :  { %v1149_v3 = vmax.f32 %v1085_v17, 0.0  ;;  %v874_v20 = vadd.f32 %v873_v19, %v631_v45 }
 0x158   :  { %v1088_v4 = vadd.f32 %v3007_v12, %v879_v18  ;;  %v525_v18 = vpop.permute.xlu1 %524 }
 0x159   :  { %v1087_v15 = vadd.f32 %v3007_v12, %v874_v20  ;;  %v2122_v59 = vpop.f32.mrb[30].mxu0  ;;  %2242 = vmatprep.mubr.f32.mxu1 %v1149_v3  ;;  %v644_v20 = vmul.f32 %v2998_v7, %v3114_v1 }
 0x15a   :  { %v889_v27 = vadd.f32 %v2122_v59, %v634_v9  ;;  %v883_v60 = vpop.f32.mrb[31].mxu0  ;;  %2243 = vmatmul.mubr.f32.gmra.mrb[26].mxu1 %v1150_v21  ;;  %v1152_v33 = vmax.f32 %v1088_v4, 0.0 }
 0x15b   :  { %v1151_v5 = vmax.f32 %v1087_v15, 0.0  ;;  %v884_v32 = vadd.f32 %v883_v60, %v633_v22 }
 0x15c   :  { %v1090_v6 = vadd.f32 %v3007_v12, %v889_v27 }
 0x15d   :  { %v1089_v34 = vadd.f32 %v3007_v12, %v884_v32  ;;  %v2125_v35 = vpop.f32.mrb[32].mxu0  ;;  %2245 = vmatprep.mubr.f32.mxu1 %v1151_v5  ;;  %v646_v5 = vmul.f32 %v2998_v7, %v3129_v23  ;;  %v648_v23 = vmul.f32 %v2998_v7, %v3140_v37 }
 0x15e   :  { %v899_v61 = vadd.f32 %v2125_v35, %v636_v29  ;;  %v893_v36 = vpop.f32.mrb[33].mxu0  ;;  %2246 = vmatmul.mubr.f32.gmra.mrb[28].mxu1 %v1152_v33  ;;  %v1154_v39 = vmax.f32 %v1090_v6, 0.0  ;;  %v645_v29 = vmul.f32 %v2998_v7, %v3132_v25  ;;  %v535_v33 = vpop.permute.xlu1 %534  ;;  %v647_v25 = vmul.f32 %v2998_v7, %v3144_v38 }
 0x15f   :  { %v1153_v62 = vmax.f32 %v1089_v34, 0.0  ;;  %v894_v10 = vadd.f32 %v893_v36, %v635_v31  ;;  %v530_v31 = vpop.permute.xlu0 %529  ;;  %v649_v38 = vmul.f32 %v2998_v7, %v3158_v53 }
 0x160   :  { %v1092_v40 = vadd.f32 %v3007_v12, %v899_v61 }
 0x161   :  { %v1091_v13 = vadd.f32 %v3007_v12, %v894_v10  ;;  %v2128_v44 = vpop.f32.mrb[34].mxu0  ;;  %2248 = vmatprep.mubr.f32.mxu1 %v1153_v62 }
 0x162   :  { %v909_v63 = vadd.f32 %v2128_v44, %v638_v43  ;;  %v903_v48 = vpop.f32.mrb[35].mxu0  ;;  %2249 = vmatmul.mubr.f32.gmra.mrb[30].mxu1 %v1154_v39  ;;  %v1156_v24 = vmax.f32 %v1092_v40, 0.0 }
 0x163   :  { %v1155_v49 = vmax.f32 %v1091_v13, 0.0  ;;  %v904_v0 = vadd.f32 %v903_v48, %v637_v47  ;;  %v545_v13 = vpop.permute.xlu1 %544  ;;  %v650_v48 = vmul.f32 %v2998_v7, %v3155_v28  ;;  %v540_v37 = vpop.permute.xlu0 %539 }
 0x164   :  { %v1094_v50 = vadd.f32 %v3007_v12, %v909_v63 }
 0x165   :  { %v1093_v16 = vadd.f32 %v3007_v12, %v904_v0  ;;  %v2131_v52 = vpop.f32.mrb[36].mxu0  ;;  %2251 = vmatprep.mubr.f32.mxu1 %v1155_v49 }
 0x166   :  { %v919_v54 = vadd.f32 %v2131_v52, %v640_v14  ;;  %v913_v55 = vpop.f32.mrb[37].mxu0  ;;  %2252 = vmatmul.mubr.f32.gmra.mrb[32].mxu1 %v1156_v24  ;;  %v1158_v42 = vmax.f32 %v1094_v50, 0.0 }
 0x167   :  { %v1157_v56 = vmax.f32 %v1093_v16, 0.0  ;;  %v914_v8 = vadd.f32 %v913_v55, %v639_v51 }
 0x168   :  { %v1096_v2 = vadd.f32 %v3007_v12, %v919_v54  ;;  %v652_v54 = vmul.f32 %v2998_v7, %v525_v18 }
 0x169   :  { %v1095_v57 = vadd.f32 %v3007_v12, %v914_v8  ;;  %v2134_v45 = vpop.f32.mrb[38].mxu0  ;;  %2254 = vmatprep.mubr.f32.mxu1 %v1157_v56  ;;  %v651_v56 = vmul.f32 %v2998_v7, %v520_v41  ;;  %v555_v8 = vpop.permute.xlu1 %554 }
 0x16a   :  { %v929_v17 = vadd.f32 %v2134_v45, %v642_v26  ;;  %v923_v58 = vpop.f32.mrb[39].mxu0  ;;  %2255 = vmatmul.mubr.f32.gmra.mrb[34].mxu1 %v1158_v42  ;;  %v1160_v9 = vmax.f32 %v1096_v2, 0.0  ;;  %v550_v42 = vpop.permute.xlu0 %549 }
 0x16b   :  { %v1159_v19 = vmax.f32 %v1095_v57, 0.0  ;;  %v924_v3 = vadd.f32 %v923_v58, %v641_v30 }
 0x16c   :  { %v1098_v21 = vadd.f32 %v3007_v12, %v929_v17  ;;  %v654_v17 = vmul.f32 %v2998_v7, %v535_v33 }
 0x16d   :  { %v1097_v4 = vadd.f32 %v3007_v12, %v924_v3  ;;  %v2137_v22 = vpop.f32.mrb[40].mxu0  ;;  %2257 = vmatprep.mubr.f32.mxu1 %v1159_v19  ;;  %v653_v19 = vmul.f32 %v2998_v7, %v530_v31 }
 0x16e   :  { %v939_v15 = vadd.f32 %v2137_v22, %v644_v20  ;;  %v933_v59 = vpop.f32.mrb[41].mxu0  ;;  %2258 = vmatmul.mubr.f32.gmra.mrb[36].mxu1 %v1160_v9  ;;  %v1162_v1 = vmax.f32 %v1098_v21, 0.0  ;;  %v565_v21 = vpop.permute.xlu1 %564  ;;  %v656_v22 = vmul.f32 %v2998_v7, %v545_v13 }
 0x16f   :  { %v1161_v27 = vmax.f32 %v1097_v4, 0.0  ;;  %v934_v60 = vadd.f32 %v933_v59, %v643_v46 }
 0x170   :  { %v1100_v32 = vadd.f32 %v3007_v12, %v939_v15  ;;  %v560_v15 = vpop.permute.xlu0 %559 }
 0x171   :  { %v1099_v11 = vadd.f32 %v3007_v12, %v934_v60  ;;  %v2140_v6 = vpop.f32.mrb[42].mxu0  ;;  %2260 = vmatprep.mubr.f32.mxu1 %v1161_v27  ;;  %v655_v60 = vmul.f32 %v2998_v7, %v540_v37 }
 0x172   :  { %v949_v34 = vadd.f32 %v2140_v6, %v646_v5  ;;  %v943_v35 = vpop.f32.mrb[43].mxu0  ;;  %2261 = vmatmul.mubr.f32.gmra.mrb[38].mxu1 %v1162_v1  ;;  %v1164_v62 = vmax.f32 %v1100_v32, 0.0  ;;  %v658_v6 = vmul.f32 %v2998_v7, %v555_v8 }
 0x173   :  { %v1163_v61 = vmax.f32 %v1099_v11, 0.0  ;;  %v944_v36 = vadd.f32 %v943_v35, %v645_v29  ;;  %v657_v35 = vmul.f32 %v2998_v7, %v550_v42 }
 0x174   :  { %v1102_v10 = vadd.f32 %v3007_v12, %v949_v34 }
 0x175   :  { %v1101_v43 = vadd.f32 %v3007_v12, %v944_v36  ;;  %v2143_v39 = vpop.f32.mrb[44].mxu0  ;;  %2263 = vmatprep.mubr.f32.mxu1 %v1163_v61  ;;  %v575_v61 = vpop.permute.xlu1 %574 }
 0x176   :  { %v959_v40 = vadd.f32 %v2143_v39, %v648_v23  ;;  %v953_v47 = vpop.f32.mrb[45].mxu0  ;;  %2264 = vmatmul.mubr.f32.gmra.mrb[40].mxu1 %v1164_v62  ;;  %v1166_v49 = vmax.f32 %v1102_v10, 0.0  ;;  %v570_v62 = vpop.permute.xlu0 %569 }
 0x177   :  { %v1165_v44 = vmax.f32 %v1101_v43, 0.0  ;;  %v954_v63 = vadd.f32 %v953_v47, %v647_v25 }
 0x178   :  { %v1104_v0 = vadd.f32 %v3007_v12, %v959_v40  ;;  %v660_v40 = vmul.f32 %v2998_v7, %v565_v21 }
 0x179   :  { %v1103_v14 = vadd.f32 %v3007_v12, %v954_v63  ;;  %v2146_v24 = vpop.f32.mrb[46].mxu0  ;;  %2266 = vmatprep.mubr.f32.mxu1 %v1165_v44  ;;  %v659_v44 = vmul.f32 %v2998_v7, %v560_v15 }
 0x17a   :  { %v969_v50 = vadd.f32 %v2146_v24, %v650_v48  ;;  %v963_v51 = vpop.f32.mrb[47].mxu0  ;;  %2267 = vmatmul.mubr.f32.gmra.mrb[42].mxu1 %v1166_v49  ;;  %v1168_v55 = vmax.f32 %v1104_v0, 0.0  ;;  %v585_v0 = vpop.permute.xlu1 %584  ;;  %v662_v24 = vmul.f32 %v2998_v7, %v575_v61 }
 0x17b   :  { %v1167_v16 = vmax.f32 %v1103_v14, 0.0  ;;  %v964_v52 = vadd.f32 %v963_v51, %v649_v38 }
 0x17c   :  { %v1106_v28 = vadd.f32 %v3007_v12, %v969_v50  ;;  %v580_v50 = vpop.permute.xlu0 %579 }
 0x17d   :  { %v1105_v26 = vadd.f32 %v3007_v12, %v964_v52  ;;  %v2149_v53 = vpop.f32.mrb[48].mxu0  ;;  %2269 = vmatprep.mubr.f32.mxu1 %v1167_v16  ;;  %v661_v52 = vmul.f32 %v2998_v7, %v570_v62 }
 0x17e   :  { %v979_v2 = vadd.f32 %v2149_v53, %v652_v54  ;;  %v973_v30 = vpop.f32.mrb[49].mxu0  ;;  %2270 = vmatmul.mubr.f32.gmra.mrb[44].mxu1 %v1168_v55  ;;  %v1170_v58 = vmax.f32 %v1106_v28, 0.0  ;;  %v664_v53 = vmul.f32 %v2998_v7, %v585_v0 }
 0x17f   :  { %v1169_v57 = vmax.f32 %v1105_v26, 0.0  ;;  %v974_v45 = vadd.f32 %v973_v30, %v651_v56  ;;  %v663_v30 = vmul.f32 %v2998_v7, %v580_v50 }
 0x180   :  { %v1108_v18 = vadd.f32 %v3007_v12, %v979_v2 }
 0x181   :  { %v1107_v3 = vadd.f32 %v3007_v12, %v974_v45  ;;  %v2152_v20 = vpop.f32.mrb[50].mxu0  ;;  %2272 = vmatprep.mubr.f32.mxu1 %v1169_v57  ;;  %v595_v57 = vpop.permute.xlu1 %594 }
 0x182   :  { %v989_v41 = vadd.f32 %v2152_v20, %v654_v17  ;;  %v983_v9 = vpop.f32.mrb[51].mxu0  ;;  %2273 = vmatmul.mubr.f32.gmra.mrb[46].mxu1 %v1170_v58  ;;  %v1172_v59 = vmax.f32 %v1108_v18, 0.0  ;;  %v590_v58 = vpop.permute.xlu0 %589 }
 0x183   :  { %v1171_v46 = vmax.f32 %v1107_v3, 0.0  ;;  %v984_v4 = vadd.f32 %v983_v9, %v653_v19 }
 0x184   :  { %v1110_v27 = vadd.f32 %v3007_v12, %v989_v41  ;;  %v666_v41 = vmul.f32 %v2998_v7, %v595_v57 }
 0x185   :  { %v1109_v5 = vadd.f32 %v3007_v12, %v984_v4  ;;  %v2155_v1 = vpop.f32.mrb[52].mxu0  ;;  %2275 = vmatprep.mubr.f32.mxu1 %v1171_v46  ;;  %v665_v46 = vmul.f32 %v2998_v7, %v590_v58  ;;  %v126_v7 = vlaneseq }
 0x186   :  { %v999_v32 = vadd.f32 %v2155_v1, %v656_v22  ;;  %v993_v29 = vpop.f32.mrb[53].mxu0  ;;  %2276 = vmatmul.mubr.f32.gmra.mrb[48].mxu1 %v1172_v59  ;;  %v1174_v31 = vmax.f32 %v1110_v27, 0.0 }
 0x187   :  { %v1173_v33 = vmax.f32 %v1109_v5, 0.0  ;;  %v994_v11 = vadd.f32 %v993_v29, %v655_v60 }
 0x188   :  { %v1112_v34 = vadd.f32 %v3007_v12, %v999_v32 }
 0x189   :  { %v1111_v36 = vadd.f32 %v3007_v12, %v994_v11  ;;  %v2158_v23 = vpop.f32.mrb[54].mxu0  ;;  %2278 = vmatprep.mubr.f32.mxu1 %v1173_v33  ;;  %v3224_v11 = vshrl.u32 %v126_v7, 7 }
 0x18a   :  { %v1009_v10 = vadd.f32 %v2158_v23, %v658_v6  ;;  %v1003_v25 = vpop.f32.mrb[55].mxu0  ;;  %2279 = vmatmul.mubr.f32.gmra.mrb[50].mxu1 %v1174_v31  ;;  %v1176_v47 = vmax.f32 %v1112_v34, 0.0  ;;  %v3229_v6 = vld [vmem:[%s3344_s7] ss:$0 sm:$0xff] }
 0x18b   :  { %v1175_v43 = vmax.f32 %v1111_v36, 0.0  ;;  %v1004_v39 = vadd.f32 %v1003_v25, %v657_v35  ;;  %v1606_v31 = vsub.s32 1, %v3224_v11  ;;  %v1614_v35 = vsub.s32 3, %v3224_v11 }
 0x18c   :  { %v1114_v13 = vadd.f32 %v3007_v12, %v1009_v10  ;;  %v1602_v61 = vsub.s32 0, %v3224_v11  ;;  %v1610_v10 = vsub.s32 2, %v3224_v11 }
 0x18d   :  { %v1113_v63 = vadd.f32 %v3007_v12, %v1004_v39  ;;  %v2161_v48 = vpop.f32.mrb[56].mxu0  ;;  %2281 = vmatprep.mubr.f32.mxu1 %v1175_v43 }
 0x18e   :  { %v1019_v37 = vadd.f32 %v2161_v48, %v660_v40  ;;  %v1013_v49 = vpop.f32.mrb[57].mxu0  ;;  %2282 = vmatmul.mubr.f32.gmra.mrb[52].mxu1 %v1176_v47  ;;  %v1178_v51 = vmax.f32 %v1114_v13, 0.0 }
 0x18f   :  { %v1177_v38 = vmax.f32 %v1113_v63, 0.0  ;;  %v1014_v14 = vadd.f32 %v1013_v49, %v659_v44  ;;  %v2514_v44 = vmov 1.0  }
 0x190   :  { %v1116_v16 = vadd.f32 %v3007_v12, %v1019_v37 }
 0x191   :  { %v1115_v54 = vadd.f32 %v3007_v12, %v1014_v14  ;;  %v2164_v55 = vpop.f32.mrb[58].mxu0  ;;  %2284 = vmatprep.mubr.f32.mxu1 %v1177_v38 }
 0x192   :  { %v1029_v28 = vadd.f32 %v2164_v55, %v662_v24  ;;  %v1023_v56 = vpop.f32.mrb[59].mxu0  ;;  %2285 = vmatmul.mubr.f32.gmra.mrb[54].mxu1 %v1178_v51  ;;  %v1180_v42 = vmax.f32 %v1116_v16, 0.0 }
 0x193   :  { %v1179_v8 = vmax.f32 %v1115_v54, 0.0  ;;  %v1024_v26 = vadd.f32 %v1023_v56, %v661_v52 }
 0x194   :  { %v1118_v2 = vadd.f32 %v3007_v12, %v1029_v28 }
 0x195   :  { %v1117_v45 = vadd.f32 %v3007_v12, %v1024_v26  ;;  %v2167_v17 = vpop.f32.mrb[60].mxu0  ;;  %2287 = vmatprep.mubr.f32.mxu1 %v1179_v8 }
 0x196   :  { %v1039_v18 = vadd.f32 %v2167_v17, %v664_v53  ;;  %v1033_v19 = vpop.f32.mrb[61].mxu0  ;;  %2288 = vmatmul.mubr.f32.gmra.mrb[56].mxu1 %v1180_v42  ;;  %v1182_v9 = vmax.f32 %v1118_v2, 0.0 }
 0x197   :  { %v1181_v3 = vmax.f32 %v1117_v45, 0.0  ;;  %v1034_v20 = vadd.f32 %v1033_v19, %v663_v30 }
 0x198   :  { %v1120_v21 = vadd.f32 %v3007_v12, %v1039_v18 }
 0x199   :  { %v1119_v4 = vadd.f32 %v3007_v12, %v1034_v20  ;;  %v2170_v22 = vpop.f32.mrb[62].mxu0  ;;  %2290 = vmatprep.mubr.f32.mxu1 %v1181_v3 }
 0x19a   :  { %v1049_v15 = vadd.f32 %v2170_v22, %v666_v41  ;;  %v1043_v59 = vpop.f32.mrb[63].mxu0  ;;  %2291 = vmatmul.mubr.f32.gmra.mrb[58].mxu1 %v1182_v9  ;;  %v1184_v5 = vmax.f32 %v1120_v21, 0.0 }
 0x19b   :  { %v1183_v27 = vmax.f32 %v1119_v4, 0.0  ;;  %v1044_v60 = vadd.f32 %v1043_v59, %v665_v46 }
 0x19c   :  { %v1122_v1 = vadd.f32 %v3007_v12, %v1049_v15 }
 0x19d   :  { %v1121_v32 = vadd.f32 %v3007_v12, %v1044_v60  ;;  %2293 = vmatprep.mubr.f32.mxu1 %v1183_v27  ;;  %v1599_v12 = vld [vmem:[%s3338_s1] sm:$0xf]  ;;  %s2515_s1 = smov [#allocation8]  }
 0x19e   :  { %2294 = vmatmul.mubr.f32.gmra.mrb[60].mxu1 %v1184_v5  ;;  %v1186_v33 = vmax.f32 %v1122_v1, 0.0  ;;  %v1607_v62 = vrot.slane %v1599_v12, %v1606_v31  ;;  %v1615_v43 = vrot.slane %v1599_v12, %v1614_v35  ;;  %v3240_v39 = vrot.slane %v1599_v12, %v1602_v61  ;;  %s1777_s7 = sshll.u32 %s2515_s1, 4  ;;  %s1778_s7 = int_to_ptr.vmem [resolvable:$true] %s1777_s7 }
 0x19f   :  { %v1185_v29 = vmax.f32 %v1121_v32, 0.0  ;;  %v3243_v40 = vrot.slane %v1599_v12, %v1610_v10  ;;  %s2481_s26 = scalar_lea.vmem %s1778_s7, 128  ;;  %p2486_p3 = scmp.lt.s32.totalorder %s1778_s7, %s1778_s7 }
 0x1a0   :  { %vm1617_vm0 = vcmp.eq.s32.totalorder %v3224_v11, %v1607_v62  ;;  %vm1619_vm1 = vcmp.eq.s32.totalorder %v3224_v11, %v1615_v43  ;;  %vm1616_vm2 = vcmp.eq.s32.totalorder %v3224_v11, %v3240_v39  ;;  %p2482_p2 = scmp.ne.s32.totalorder %s1778_s7, %s2481_s26  ;;  %p2487_p4 = scmp.lt.s32.totalorder %s2481_s26, %s2481_s26 }
 0x1a1   :  { %2296 = vmatprep.mubr.f32.mxu1 %v1185_v29  ;;  %1809 = vmatprep.mubr.msk.f32.mxu0 %vm1617_vm0, %v2514_v44  ;;  %vm1618_vm3 = vcmp.eq.s32.totalorder %v3224_v11, %v3243_v40 }
 0x1a2   :  { %2297 = vmatmul.mubr.f32.gmra.mrb[62].mxu1 %v1186_v33  ;;  %p2488_p5 = por %p2487_p4, %p2486_p3 }
 0x1a3   :  { %1811 = vmatprep.mubr.msk.f32.mxu1 %vm1619_vm1, %v2514_v44 }
 0x1a4   :  { %p2489_p6 = pnand %p2488_p5, %p2482_p2 }
 0x1f9   :  { %v2205_v34 = vpop.f32.mrb[0].mxu1 }
 0x1fa   :  { %v1282_v36 = vadd.f32 %v2205_v34, %v3229_v6  ;;  %v1276_v23 = vpop.f32.mrb[1].mxu1 }
 0x1fb   :  { %v1277_v25 = vadd.f32 %v3229_v6, %v1276_v23 }
 0x1fd   :  { %v2365_v47 = vpack.c.bf16 %v1282_v36, %v1277_v25  ;;  %v2208_v13 = vpop.f32.mrb[2].mxu1 }
 0x1fe   :  { %v1292_v63 = vadd.f32 %v2208_v13, %v3229_v6  ;;  %v1286_v48 = vpop.f32.mrb[3].mxu1 }
 0x1ff   :  { %v1287_v37 = vadd.f32 %v3229_v6, %v1286_v48 }
 0x201   :  { %v2369_v49 = vpack.c.bf16 %v1292_v63, %v1287_v37  ;;  %v2211_v0 = vpop.f32.mrb[4].mxu1 }
 0x202   :  { %v1302_v38 = vadd.f32 %v2211_v0, %v3229_v6  ;;  %v1296_v14 = vpop.f32.mrb[5].mxu1 }
 0x203   :  { %v1297_v24 = vadd.f32 %v3229_v6, %v1296_v14 }
 0x205   :  { %v2373_v50 = vpack.c.bf16 %v1302_v38, %v1297_v24  ;;  %v2214_v51 = vpop.f32.mrb[6].mxu1 }
 0x206   :  { %v1312_v16 = vadd.f32 %v2214_v51, %v3229_v6  ;;  %v1306_v52 = vpop.f32.mrb[7].mxu1 }
 0x207   :  { %v1307_v54 = vadd.f32 %v3229_v6, %v1306_v52 }
 0x209   :  { %v2377_v55 = vpack.c.bf16 %v1312_v16, %v1307_v54  ;;  %v2217_v28 = vpop.f32.mrb[8].mxu1 }
 0x20a   :  { %v1322_v56 = vadd.f32 %v2217_v28, %v3229_v6  ;;  %v1316_v8 = vpop.f32.mrb[9].mxu1 }
 0x20b   :  { %v1317_v26 = vadd.f32 %v3229_v6, %v1316_v8 }
 0x20d   :  { %v2381_v53 = vpack.c.bf16 %v1322_v56, %v1317_v26  ;;  %v2220_v42 = vpop.f32.mrb[10].mxu1 }
 0x20e   :  { %v1332_v2 = vadd.f32 %v2220_v42, %v3229_v6  ;;  %v1326_v30 = vpop.f32.mrb[11].mxu1 }
 0x20f   :  { %v1327_v57 = vadd.f32 %v3229_v6, %v1326_v30 }
 0x211   :  { %v2385_v45 = vpack.c.bf16 %v1332_v2, %v1327_v57  ;;  %v2223_v17 = vpop.f32.mrb[12].mxu1 }
 0x212   :  { %v1342_v58 = vadd.f32 %v2223_v17, %v3229_v6  ;;  %v1336_v18 = vpop.f32.mrb[13].mxu1 }
 0x213   :  { %v1337_v19 = vadd.f32 %v3229_v6, %v1336_v18 }
 0x215   :  { %v2389_v3 = vpack.c.bf16 %v1342_v58, %v1337_v19  ;;  %v2226_v20 = vpop.f32.mrb[14].mxu1 }
 0x216   :  { %v3265_v41 = vadd.f32 %v2226_v20, %v3229_v6  ;;  %v1346_v9 = vpop.f32.mrb[15].mxu1 }
 0x217   :  { %v1347_v21 = vadd.f32 %v3229_v6, %v1346_v9 }
 0x219   :  { %v2393_v46 = vpack.c.bf16 %v3265_v41, %v1347_v21  ;;  %v2229_v4 = vpop.f32.mrb[16].mxu1 }
 0x21a   :  { %v1362_v22 = vadd.f32 %v2229_v4, %v3229_v6  ;;  %v1356_v15 = vpop.f32.mrb[17].mxu1 }
 0x21b   :  { %v1357_v59 = vadd.f32 %v3229_v6, %v1356_v15 }
 0x21d   :  { %v2363_v27 = vpack.c.bf16 %v1362_v22, %v1357_v59  ;;  %v2232_v60 = vpop.f32.mrb[18].mxu1 }
 0x21e   :  { %v1372_v5 = vadd.f32 %v2232_v60, %v3229_v6  ;;  %v1366_v1 = vpop.f32.mrb[19].mxu1 }
 0x21f   :  { %v1367_v32 = vadd.f32 %v3229_v6, %v1366_v1  ;;  %2364 = vmatprep.subr.bf16.mxu0 %v2363_v27 }
 0x220   :  { %2366 = vmatpush3.bf16.msra.mxu0 %v2365_v47 }
 0x221   :  { %v2367_v29 = vpack.c.bf16 %v1372_v5, %v1367_v32  ;;  %v2235_v33 = vpop.f32.mrb[20].mxu1 }
 0x222   :  { %v1382_v7 = vadd.f32 %v2235_v33, %v3229_v6  ;;  %v1376_v31 = vpop.f32.mrb[21].mxu1 }
 0x223   :  { %v1377_v34 = vadd.f32 %v3229_v6, %v1376_v31  ;;  %2368 = vmatprep.subr.bf16.mxu0 %v2367_v29 }
 0x224   :  { %2370 = vmatpush3.bf16.msra.mxu0 %v2369_v49 }
 0x225   :  { %v2371_v12 = vpack.c.bf16 %v1382_v7, %v1377_v34  ;;  %v2238_v35 = vpop.f32.mrb[22].mxu1 }
 0x226   :  { %v1392_v61 = vadd.f32 %v2238_v35, %v3229_v6  ;;  %v1386_v36 = vpop.f32.mrb[23].mxu1 }
 0x227   :  { %v1387_v23 = vadd.f32 %v3229_v6, %v1386_v36  ;;  %2372 = vmatprep.subr.bf16.mxu0 %v2371_v12 }
 0x228   :  { %2374 = vmatpush3.bf16.msra.mxu0 %v2373_v50 }
 0x229   :  { %v2375_v62 = vpack.c.bf16 %v1392_v61, %v1387_v23  ;;  %v2241_v10 = vpop.f32.mrb[24].mxu1 }
 0x22a   :  { %v1402_v25 = vadd.f32 %v2241_v10, %v3229_v6  ;;  %v1396_v43 = vpop.f32.mrb[25].mxu1 }
 0x22b   :  { %v1397_v47 = vadd.f32 %v3229_v6, %v1396_v43  ;;  %2376 = vmatprep.subr.bf16.mxu0 %v2375_v62 }
 0x22c   :  { %2378 = vmatpush3.bf16.msra.mxu0 %v2377_v55 }
 0x22d   :  { %v2379_v13 = vpack.c.bf16 %v1402_v25, %v1397_v47  ;;  %v2244_v63 = vpop.f32.mrb[26].mxu1 }
 0x22e   :  { %v1412_v48 = vadd.f32 %v2244_v63, %v3229_v6  ;;  %v1406_v37 = vpop.f32.mrb[27].mxu1 }
 0x22f   :  { %v1407_v49 = vadd.f32 %v3229_v6, %v1406_v37  ;;  %2380 = vmatprep.subr.bf16.mxu0 %v2379_v13 }
 0x230   :  { %2382 = vmatpush3.bf16.msra.mxu0 %v2381_v53 }
 0x231   :  { %v2383_v0 = vpack.c.bf16 %v1412_v48, %v1407_v49  ;;  %v2247_v38 = vpop.f32.mrb[28].mxu1 }
 0x232   :  { %v1422_v14 = vadd.f32 %v2247_v38, %v3229_v6  ;;  %v1416_v24 = vpop.f32.mrb[29].mxu1 }
 0x233   :  { %v1417_v50 = vadd.f32 %v3229_v6, %v1416_v24  ;;  %2384 = vmatprep.subr.bf16.mxu0 %v2383_v0 }
 0x234   :  { %2386 = vmatpush3.bf16.msra.mxu0 %v2385_v45 }
 0x235   :  { %v2387_v51 = vpack.c.bf16 %v1422_v14, %v1417_v50  ;;  %v2250_v16 = vpop.f32.mrb[30].mxu1 }
 0x236   :  { %v1432_v52 = vadd.f32 %v2250_v16, %v3229_v6  ;;  %v1426_v54 = vpop.f32.mrb[31].mxu1 }
 0x237   :  { %v1427_v55 = vadd.f32 %v3229_v6, %v1426_v54  ;;  %2388 = vmatprep.subr.bf16.mxu0 %v2387_v51 }
 0x238   :  { %2390 = vmatpush3.bf16.msra.mxu0 %v2389_v3 }
 0x239   :  { %v2391_v28 = vpack.c.bf16 %v1432_v52, %v1427_v55  ;;  %v2253_v56 = vpop.f32.mrb[32].mxu1 }
 0x23a   :  { %v1442_v8 = vadd.f32 %v2253_v56, %v3229_v6  ;;  %v1436_v26 = vpop.f32.mrb[33].mxu1 }
 0x23b   :  { %v1437_v53 = vadd.f32 %v3229_v6, %v1436_v26  ;;  %2392 = vmatprep.subr.bf16.mxu0 %v2391_v28 }
 0x23c   :  { %2394 = vmatpush3.bf16.msra.mxu0 %v2393_v46 }
 0x23d   :  { %v2397_v42 = vpack.c.bf16 %v1442_v8, %v1437_v53  ;;  %v2256_v2 = vpop.f32.mrb[34].mxu1 }
 0x23e   :  { %v1452_v30 = vadd.f32 %v2256_v2, %v3229_v6  ;;  %v1446_v57 = vpop.f32.mrb[35].mxu1 }
 0x23f   :  { %v1447_v45 = vadd.f32 %v3229_v6, %v1446_v57  ;;  %1810 = vmatmul.mubr.msk.f32.vlgmr.msra.gmra.mrb[64].mxu0 %vm1616_vm2, %v2514_v44 }
 0x241   :  { %v2401_v17 = vpack.c.bf16 %v1452_v30, %v1447_v45  ;;  %v2259_v58 = vpop.f32.mrb[36].mxu1 }
 0x242   :  { %v1462_v18 = vadd.f32 %v2259_v58, %v3229_v6  ;;  %v1456_v19 = vpop.f32.mrb[37].mxu1 }
 0x243   :  { %v1457_v3 = vadd.f32 %v3229_v6, %v1456_v19 }
 0x245   :  { %v2405_v20 = vpack.c.bf16 %v1462_v18, %v1457_v3  ;;  %v2262_v41 = vpop.f32.mrb[38].mxu1 }
 0x246   :  { %v1472_v9 = vadd.f32 %v2262_v41, %v3229_v6  ;;  %v1466_v21 = vpop.f32.mrb[39].mxu1 }
 0x247   :  { %v1467_v46 = vadd.f32 %v3229_v6, %v1466_v21 }
 0x249   :  { %v2409_v4 = vpack.c.bf16 %v1472_v9, %v1467_v46  ;;  %v2265_v22 = vpop.f32.mrb[40].mxu1 }
 0x24a   :  { %v1482_v15 = vadd.f32 %v2265_v22, %v3229_v6  ;;  %v1476_v39 = vpop.f32.mrb[41].mxu1 }
 0x24b   :  { %v1477_v59 = vadd.f32 %v3229_v6, %v1476_v39 }
 0x24d   :  { %v2413_v27 = vpack.c.bf16 %v1482_v15, %v1477_v59  ;;  %v2268_v60 = vpop.f32.mrb[42].mxu1 }
 0x24e   :  { %v1492_v5 = vadd.f32 %v2268_v60, %v3229_v6  ;;  %v1486_v1 = vpop.f32.mrb[43].mxu1 }
 0x24f   :  { %v1487_v32 = vadd.f32 %v3229_v6, %v1486_v1 }
 0x251   :  { %v2417_v29 = vpack.c.bf16 %v1492_v5, %v1487_v32  ;;  %v2271_v33 = vpop.f32.mrb[44].mxu1 }
 0x252   :  { %v1502_v7 = vadd.f32 %v2271_v33, %v3229_v6  ;;  %v1496_v31 = vpop.f32.mrb[45].mxu1 }
 0x253   :  { %v1497_v34 = vadd.f32 %v3229_v6, %v1496_v31 }
 0x255   :  { %v2421_v12 = vpack.c.bf16 %v1502_v7, %v1497_v34  ;;  %v2274_v35 = vpop.f32.mrb[46].mxu1 }
 0x256   :  { %v1512_v61 = vadd.f32 %v2274_v35, %v3229_v6  ;;  %v1506_v36 = vpop.f32.mrb[47].mxu1 }
 0x257   :  { %v1507_v23 = vadd.f32 %v3229_v6, %v1506_v36 }
 0x259   :  { %v2425_v62 = vpack.c.bf16 %v1512_v61, %v1507_v23  ;;  %v2277_v10 = vpop.f32.mrb[48].mxu1 }
 0x25a   :  { %v1522_v25 = vadd.f32 %v2277_v10, %v3229_v6  ;;  %v1516_v43 = vpop.f32.mrb[49].mxu1 }
 0x25b   :  { %v1517_v47 = vadd.f32 %v3229_v6, %v1516_v43 }
 0x25d   :  { %v2395_v13 = vpack.c.bf16 %v1522_v25, %v1517_v47  ;;  %v2280_v63 = vpop.f32.mrb[50].mxu1 }
 0x25e   :  { %v1532_v48 = vadd.f32 %v2280_v63, %v3229_v6  ;;  %v1526_v37 = vpop.f32.mrb[51].mxu1 }
 0x25f   :  { %v1527_v49 = vadd.f32 %v3229_v6, %v1526_v37  ;;  %2396 = vmatprep.subr.bf16.mxu1 %v2395_v13 }
 0x260   :  { %2398 = vmatpush3.bf16.msra.mxu1 %v2397_v42 }
 0x261   :  { %v2399_v0 = vpack.c.bf16 %v1532_v48, %v1527_v49  ;;  %v2283_v38 = vpop.f32.mrb[52].mxu1 }
 0x262   :  { %v1542_v14 = vadd.f32 %v2283_v38, %v3229_v6  ;;  %v1536_v24 = vpop.f32.mrb[53].mxu1 }
 0x263   :  { %v1537_v50 = vadd.f32 %v3229_v6, %v1536_v24  ;;  %2400 = vmatprep.subr.bf16.mxu1 %v2399_v0 }
 0x264   :  { %2402 = vmatpush3.bf16.msra.mxu1 %v2401_v17 }
 0x265   :  { %v2403_v51 = vpack.c.bf16 %v1542_v14, %v1537_v50  ;;  %v2286_v16 = vpop.f32.mrb[54].mxu1 }
 0x266   :  { %v1552_v52 = vadd.f32 %v2286_v16, %v3229_v6  ;;  %v1546_v54 = vpop.f32.mrb[55].mxu1 }
 0x267   :  { %v1547_v55 = vadd.f32 %v3229_v6, %v1546_v54  ;;  %2404 = vmatprep.subr.bf16.mxu1 %v2403_v51 }
 0x268   :  { %2406 = vmatpush3.bf16.msra.mxu1 %v2405_v20 }
 0x269   :  { %v2407_v28 = vpack.c.bf16 %v1552_v52, %v1547_v55  ;;  %v2289_v56 = vpop.f32.mrb[56].mxu1 }
 0x26a   :  { %v1562_v8 = vadd.f32 %v2289_v56, %v3229_v6  ;;  %v1556_v26 = vpop.f32.mrb[57].mxu1 }
 0x26b   :  { %v1557_v53 = vadd.f32 %v3229_v6, %v1556_v26  ;;  %2408 = vmatprep.subr.bf16.mxu1 %v2407_v28 }
 0x26c   :  { %2410 = vmatpush3.bf16.msra.mxu1 %v2409_v4 }
 0x26d   :  { %v2411_v42 = vpack.c.bf16 %v1562_v8, %v1557_v53  ;;  %v2292_v2 = vpop.f32.mrb[58].mxu1 }
 0x26e   :  { %v1572_v30 = vadd.f32 %v2292_v2, %v3229_v6  ;;  %v1566_v57 = vpop.f32.mrb[59].mxu1 }
 0x26f   :  { %v1567_v45 = vadd.f32 %v3229_v6, %v1566_v57  ;;  %2412 = vmatprep.subr.bf16.mxu1 %v2411_v42 }
 0x270   :  { %2414 = vmatpush3.bf16.msra.mxu1 %v2413_v27 }
 0x271   :  { %v2415_v17 = vpack.c.bf16 %v1572_v30, %v1567_v45  ;;  %v2295_v58 = vpop.f32.mrb[60].mxu1 }
 0x272   :  { %v1582_v18 = vadd.f32 %v2295_v58, %v3229_v6  ;;  %v1576_v19 = vpop.f32.mrb[61].mxu1 }
 0x273   :  { %v1577_v3 = vadd.f32 %v3229_v6, %v1576_v19  ;;  %2416 = vmatprep.subr.bf16.mxu1 %v2415_v17 }
 0x274   :  { %2418 = vmatpush3.bf16.msra.mxu1 %v2417_v29 }
 0x275   :  { %v2419_v20 = vpack.c.bf16 %v1582_v18, %v1577_v3  ;;  %v2298_v41 = vpop.f32.mrb[62].mxu1 }
 0x276   :  { %v1592_v9 = vadd.f32 %v2298_v41, %v3229_v6  ;;  %v1586_v21 = vpop.f32.mrb[63].mxu1 }
 0x277   :  { %v1587_v46 = vadd.f32 %v3229_v6, %v1586_v21  ;;  %2420 = vmatprep.subr.bf16.mxu1 %v2419_v20 }
 0x278   :  { %2422 = vmatpush3.bf16.msra.mxu1 %v2421_v12 }
 0x279   :  { %v2423_v4 = vpack.c.bf16 %v1592_v9, %v1587_v46 }
 0x27b   :  { %2424 = vmatprep.subr.bf16.mxu1 %v2423_v4 }
 0x27c   :  { %2426 = vmatpush3.bf16.msra.mxu1 %v2425_v62 }
 0x27f   :  { %1812 = vmatmul.mubr.msk.f32.vlgmr.msra.gmra.mrb[64].mxu1 %vm1618_vm3, %v2514_v44 }
 0x312   :  { %v2005_v22 = vpop.f32.mrb[64].mxu0 }
 0x313   :  { %v2006_v15 = vpop.f32.mrb[65].mxu0 }
 0x314   :  { %v2007_v39 = vadd.f32 %v2006_v15, %v2005_v22 }
 0x352   :  { %v2040_v59 = vpop.f32.mrb[64].mxu1 }
 0x353   :  { %v2041_v27 = vpop.f32.mrb[65].mxu1 }
 0x354   :  { %v2042_v60 = vadd.f32 %v2041_v27, %v2040_v59 }
 0x356   :  { %v1766_v5 = vadd.f32 %v2042_v60, %v2007_v39 }
 0x358   :  { %1770 = vst [vmem:[#allocation8] sm:$0xff] %v1766_v5 }
 0x359   :  { %2492 = shalt.err (!%p2489_p6)
}
 0x35a   :  { %s2493_s3 = scalar_lea.hbm %s3345_s8, 128 }
 0x35b   :  { %p2494_p7 = scmp.ne.s32.totalorder %s3345_s8, %s2493_s3  ;;  %p2497_p8 = scmp.lt.u32.totalorder %s2493_s3, %s3345_s8 }
 0x35d   :  { %p2499_p9 = pnand %p2497_p8, %p2494_p7 }
 0x35f   :  { %2502 = shalt.err (!%p2499_p9)
}
 0x360   :  { %1780 = dma.vmem_to_hbm [thread:$0]  %s1778_s7, 128, %s3345_s8, [#allocation5]  }
 0x361   :  { %2507 = dma.done.wait [#allocation5], 128  }
 0x362   :  { %2508 = vsyncadd [#allocation5], 4294967168 }
 0x363   :  { %1784 = vsyncpa [#allocation4], 1 }
 0x364   :  { %1785 = vsyncpa [#allocation7], 1 }
 0x365   :  { %1786 = vsyncpa [#allocation5], 1 }

</bundles_post_ra>
